<compile_context>
chip_gen: v7x
topology: tpu7x:2x2x1
jax: 0.10.0
libtpu: 0.0.40
codegen_flags: <defaults>
</compile_context>

<pallas_src>
import functools

import jax
import jax.numpy as jnp
from jax.experimental import pallas as pl
from jax.experimental.pallas import tpu as pltpu


# ---------------------------------------------------------------------------
# Kernel: one (batch, layer) grid step of the fused forward
# ---------------------------------------------------------------------------
def decoder_layer_kernel(x_ref, pe_ref,
                         wq_ref, bq_ref, wk_ref, bk_ref, wv_ref, bv_ref,
                         wo_ref, bo_ref, g1_ref, be1_ref,
                         w1_ref, b1_ref, w2_ref, b2_ref, g2_ref, be2_ref,
                         fcw_ref, fcb_ref,
                         o_ref, h_ref, *, num_heads, is_causal):
    f32, bf16 = jnp.float32, jnp.bfloat16
    l = pl.program_id(1)                      # layer index (innermost, carried)
    S, D = h_ref.shape
    H = num_heads
    Dh = D // H
    scale = jnp.float32(1.0 / (Dh ** 0.5))

    # --- layer 0: load embedding + positional encoding into the VMEM carry ---
    @pl.when(l == 0)
    def _():
        h_ref[...] = x_ref[...].astype(f32) + pe_ref[...].astype(f32)

    h = h_ref[...]                            # (S, D) f32, resident across layers

    def layernorm(v, g, b):
        mu = jnp.mean(v, axis=-1, keepdims=True)
        var = jnp.mean((v - mu) ** 2, axis=-1, keepdims=True)
        return (v - mu) * jax.lax.rsqrt(var + 1e-5) * g + b

    def mm(a, w_ref, b_ref):
        # bf16 operands on the MXU, f32 accumulation, f32 bias epilogue.
        return jnp.dot(a.astype(bf16), w_ref[...],
                       preferred_element_type=f32) + b_ref[...]

    # --- causal multi-head self-attention ------------------------------------
    q = mm(h, wq_ref, bq_ref)                 # (S, D)
    k = mm(h, wk_ref, bk_ref)
    v = mm(h, wv_ref, bv_ref)

    # TODO(synk): head split/merge kept as stack/concat of static lane slices;
    # a single 'n(hd)->hnd' relayout would need Mosaic lane-splitting reshape
    # support, which is not reliably available for these shapes.
    def heads(t):                              # (S, D) -> (H, S, Dh), bf16
        return jnp.stack([t[:, i * Dh:(i + 1) * Dh] for i in range(H)],
                         axis=0).astype(bf16)

    qh, kh, vh = heads(q), heads(k), heads(v)
    s = jnp.einsum('hqd,hkd->hqk', qh, kh,
                   preferred_element_type=f32) * scale         # (H, S, S) f32
    if is_causal:
        row = jax.lax.broadcasted_iota(jnp.int32, (S, S), 0)
        col = jax.lax.broadcasted_iota(jnp.int32, (S, S), 1)
        s = jnp.where((col <= row)[None, :, :], s, jnp.float32(-1e9))
    s = s - jnp.max(s, axis=-1, keepdims=True)
    p = jnp.exp(s)
    p = p / jnp.sum(p, axis=-1, keepdims=True)  # exact softmax (f32)
    ctx = jnp.einsum('hqk,hkd->hqd', p.astype(bf16), vh,
                     preferred_element_type=f32)                # (H, S, Dh)
    attn = jnp.concatenate([ctx[i] for i in range(H)], axis=-1)  # (S, D)
    attn = mm(attn, wo_ref, bo_ref)

    h1 = layernorm(h + attn, g1_ref[...], be1_ref[...])

    # --- position-wise feed-forward -------------------------------------------
    ff = jnp.maximum(mm(h1, w1_ref, b1_ref), 0.0)
    ff = mm(ff, w2_ref, b2_ref)
    h2 = layernorm(h1 + ff, g2_ref[...], be2_ref[...])

    h_ref[...] = h2                            # carry to next layer grid step

    # --- final vocab projection (lane-dense padded cols) on the last layer ----
    @pl.when(l == pl.num_programs(1) - 1)
    def _():
        o_ref[...] = mm(h2, fcw_ref, fcb_ref).astype(o_ref.dtype)


# ---------------------------------------------------------------------------
# Wrapper
# ---------------------------------------------------------------------------
def transformer_from_embedding(x, params, num_heads, is_causal=True):
    B, S, D = x.shape
    L = len(params["layers"])
    d_ff = params["layers"][0]["w1"].shape[1]
    V = params["fc_w"].shape[1]
    Vp = int(pl.cdiv(V, 128)) * 128            # lane-dense padded vocab

    f32, bf16 = jnp.float32, jnp.bfloat16
    x = x.astype(f32)
    pe = params["pe"][:S].astype(f32)

    def stack(name, dtype):
        return jnp.stack([lp[name] for lp in params["layers"]],
                         axis=0).astype(dtype)

    # bf16 weight slabs (MXU operands) halve HBM->VMEM weight traffic;
    # biases / LayerNorm params stay f32 (VPU epilogue math).
    wq, wk, wv, wo = (stack(n, bf16) for n in ("wq", "wk", "wv", "wo"))
    w1, w2 = stack("w1", bf16), stack("w2", bf16)
    bq, bk, bv, bo = (stack(n, f32) for n in ("bq", "bk", "bv", "bo"))
    b1, b2 = stack("b1", f32), stack("b2", f32)
    g1, be1, g2, be2 = (stack(n, f32) for n in ("g1", "be1", "g2", "be2"))

    fc_w = jnp.pad(params["fc_w"], ((0, 0), (0, Vp - V))).astype(bf16)
    fc_b = jnp.pad(params["fc_b"], ((0, 0), (0, Vp - V))).astype(f32)

    def layer_spec(arr):   # stream one layer's slab per grid step
        return pl.BlockSpec((None,) + arr.shape[1:], lambda b, l: (l, 0, 0))

    def const_spec(arr):   # same block every step -> fetched once
        return pl.BlockSpec(arr.shape, lambda b, l: (0,) * arr.ndim)

    in_specs = [
        pl.BlockSpec((None, S, D), lambda b, l: (b, 0, 0)),    # x (per batch)
        const_spec(pe),                                        # pe
        layer_spec(wq), layer_spec(bq), layer_spec(wk), layer_spec(bk),
        layer_spec(wv), layer_spec(bv), layer_spec(wo), layer_spec(bo),
        layer_spec(g1), layer_spec(be1),
        layer_spec(w1), layer_spec(b1), layer_spec(w2), layer_spec(b2),
        layer_spec(g2), layer_spec(be2),
        const_spec(fc_w), const_spec(fc_b),
    ]
    out_spec = pl.BlockSpec((None, S, Vp), lambda b, l: (b, 0, 0))

    args = (x, pe, wq, bq, wk, bk, wv, bv, wo, bo, g1, be1,
            w1, b1, w2, b2, g2, be2, fc_w, fc_b)

    flops = int(B * L * (8 * S * D * D + 4 * S * S * D + 4 * S * D * d_ff)
                + B * 2 * S * D * Vp)
    transcendentals = int(B * L * (num_heads * S * S + 2 * S))
    bytes_accessed = int(sum(int(a.size) * a.dtype.itemsize for a in args)
                         + B * S * Vp * 4)

    out = pl.pallas_call(
        functools.partial(decoder_layer_kernel,
                          num_heads=num_heads, is_causal=is_causal),
        out_shape=jax.ShapeDtypeStruct((B, S, Vp), jnp.float32),
        grid_spec=pltpu.PrefetchScalarGridSpec(
            num_scalar_prefetch=0,
            grid=(B, L),                  # batch parallel, layer carried (last)
            in_specs=in_specs,
            out_specs=out_spec,
            scratch_shapes=[pltpu.VMEM((S, D), jnp.float32)],   # carried `h`
        ),
        compiler_params=pltpu.CompilerParams(
            dimension_semantics=("parallel", "arbitrary"),
            vmem_limit_bytes=32 * 1024 * 1024),   # raise at production sizes
        cost_estimate=pl.CostEstimate(
            flops=flops, transcendentals=transcendentals,
            bytes_accessed=bytes_accessed),
    )(*args)
    return out[:, :, :V]


# ---------------------------------------------------------------------------
# Parameter construction (deterministic, PyTorch-default-style init)
# ---------------------------------------------------------------------------
def init_linear(key, din, dout):
    kw, kb = jax.random.split(key)
    bound = 1.0 / (din ** 0.5)
    w = jax.random.uniform(kw, (din, dout), jnp.float32, -bound, bound)
    b = jax.random.uniform(kb, (1, dout), jnp.float32, -bound, bound)
    return w, b


def make_positional_encoding(max_seq, d_model):
    pos = jnp.arange(max_seq, dtype=jnp.float32)[:, None]
    div = jnp.exp(jnp.arange(0, d_model, 2, dtype=jnp.float32)
                  * (-jnp.log(10000.0) / d_model))
    pe = jnp.zeros((max_seq, d_model), jnp.float32)
    pe = pe.at[:, 0::2].set(jnp.sin(pos * div))
    pe = pe.at[:, 1::2].set(jnp.cos(pos * div))
    return pe


def init_params(key, tgt_vocab, d_model, num_layers, d_ff, max_seq):
    keys = jax.random.split(key, num_layers + 1)
    layers = []
    for li in range(num_layers):
        ks = jax.random.split(keys[li], 6)
        wq, bq = init_linear(ks[0], d_model, d_model)
        wk, bk = init_linear(ks[1], d_model, d_model)
        wv, bv = init_linear(ks[2], d_model, d_model)
        wo, bo = init_linear(ks[3], d_model, d_model)
        w1, b1 = init_linear(ks[4], d_model, d_ff)
        w2, b2 = init_linear(ks[5], d_ff, d_model)
        layers.append(dict(
            wq=wq, bq=bq, wk=wk, bk=bk, wv=wv, bv=bv, wo=wo, bo=bo,
            w1=w1, b1=b1, w2=w2, b2=b2,
            g1=jnp.ones((1, d_model), jnp.float32),
            be1=jnp.zeros((1, d_model), jnp.float32),
            g2=jnp.ones((1, d_model), jnp.float32),
            be2=jnp.zeros((1, d_model), jnp.float32),
        ))
    fc_w, fc_b = init_linear(keys[-1], d_model, tgt_vocab)
    return dict(layers=layers, fc_w=fc_w, fc_b=fc_b,
                pe=make_positional_encoding(max_seq, d_model))


# ---------------------------------------------------------------------------
# Pure-JAX f32 reference for correctness check
# ---------------------------------------------------------------------------
def reference_forward(x, params, num_heads, is_causal=True):
    S = x.shape[1]
    h = x + params["pe"][:S][None]

    def ln(v, g, b):
        mu = jnp.mean(v, -1, keepdims=True)
        var = jnp.mean((v - mu) ** 2, -1, keepdims=True)
        return (v - mu) * jax.lax.rsqrt(var + 1e-5) * g + b

    for p in params["layers"]:
        B, S, D = h.shape
        Dh = D // num_heads
        q = (h @ p["wq"] + p["bq"]).reshape(B, S, num_heads, Dh).transpose(0, 2, 1, 3)
        k = (h @ p["wk"] + p["bk"]).reshape(B, S, num_heads, Dh).transpose(0, 2, 1, 3)
        v = (h @ p["wv"] + p["bv"]).reshape(B, S, num_heads, Dh).transpose(0, 2, 1, 3)
        s = jnp.einsum("bhqd,bhkd->bhqk", q, k) / (Dh ** 0.5)
        if is_causal:
            mask = jnp.tril(jnp.ones((S, S), bool))
            s = jnp.where(mask, s, -1e9)
        a = jax.nn.softmax(s, -1)
        attn = jnp.einsum("bhqk,bhkd->bhqd", a, v).transpose(0, 2, 1, 3).reshape(B, S, D)
        attn = attn @ p["wo"] + p["bo"]
        h = ln(h + attn, p["g1"], p["be1"])
        ff = jnp.maximum(h @ p["w1"] + p["b1"], 0.0) @ p["w2"] + p["b2"]
        h = ln(h + ff, p["g2"], p["be2"])
    return h @ params["fc_w"] + params["fc_b"]


# ---------------------------------------------------------------------------
if __name__ == "__main__":
    tgt_vocab_size = 50
    d_model = 32
    num_heads = 4
    num_layers = 2
    d_ff = 64
    max_seq_length = 16
    batch, seq = 2, 8

    key = jax.random.PRNGKey(0)
    k_params, k_x = jax.random.split(key)
    params = init_params(k_params, tgt_vocab_size, d_model, num_layers,
                         d_ff, max_seq_length)
    x = jax.random.normal(k_x, (batch, seq, d_model), jnp.float32)

    out = transformer_from_embedding(x, params, num_heads, is_causal=True)
    out = jax.block_until_ready(out)

    ref = reference_forward(x, params, num_heads, is_causal=True)
    assert out.shape == (batch, seq, tgt_vocab_size)
    # tolerance accounts for bf16 MXU operand rounding vs. the f32 reference
    assert jnp.allclose(out, ref, rtol=3e-2, atol=3e-2), "mismatch vs reference"

    print("KERNEL_OK")
</pallas_src>

<mosaic_0001>
module attributes {stable_mosaic.version = 11 : i64} {
  func.func @decoder_layer_kernel(%arg0: i32, %arg1: i32, %arg2: memref<1x8x32xf32, #tpu.memory_space<vmem>>, %arg3: memref<8x32xf32, #tpu.memory_space<vmem>>, %arg4: memref<1x32x32xbf16, #tpu.memory_space<vmem>>, %arg5: memref<1x1x32xf32, #tpu.memory_space<vmem>>, %arg6: memref<1x32x32xbf16, #tpu.memory_space<vmem>>, %arg7: memref<1x1x32xf32, #tpu.memory_space<vmem>>, %arg8: memref<1x32x32xbf16, #tpu.memory_space<vmem>>, %arg9: memref<1x1x32xf32, #tpu.memory_space<vmem>>, %arg10: memref<1x32x32xbf16, #tpu.memory_space<vmem>>, %arg11: memref<1x1x32xf32, #tpu.memory_space<vmem>>, %arg12: memref<1x1x32xf32, #tpu.memory_space<vmem>>, %arg13: memref<1x1x32xf32, #tpu.memory_space<vmem>>, %arg14: memref<1x32x64xbf16, #tpu.memory_space<vmem>>, %arg15: memref<1x1x64xf32, #tpu.memory_space<vmem>>, %arg16: memref<1x64x32xbf16, #tpu.memory_space<vmem>>, %arg17: memref<1x1x32xf32, #tpu.memory_space<vmem>>, %arg18: memref<1x1x32xf32, #tpu.memory_space<vmem>>, %arg19: memref<1x1x32xf32, #tpu.memory_space<vmem>>, %arg20: memref<32x128xbf16, #tpu.memory_space<vmem>>, %arg21: memref<1x128xf32, #tpu.memory_space<vmem>>, %arg22: memref<1x8x128xf32, #tpu.memory_space<vmem>>, %arg23: memref<8x32xf32, #tpu.memory_space<vmem>>) attributes {dimension_semantics = [#tpu.dimension_semantics<parallel>, #tpu.dimension_semantics<arbitrary>], iteration_bounds = array<i64: 2, 2>, scalar_prefetch = 0 : i64, scratch_operands = 1 : i64, tpu.core_type = #tpu.core_type<tc>, window_params = [{transform_indices = @transform_0, window_bounds = array<i64: 1, 8, 32>}, {pipeline_mode = #tpu.pipeline_mode<synchronous>, transform_indices = @transform_1, window_bounds = array<i64: 8, 32>}, {transform_indices = @transform_2, window_bounds = array<i64: 1, 32, 32>}, {transform_indices = @transform_3, window_bounds = array<i64: 1, 1, 32>}, {transform_indices = @transform_4, window_bounds = array<i64: 1, 32, 32>}, {transform_indices = @transform_5, window_bounds = array<i64: 1, 1, 32>}, {transform_indices = @transform_6, window_bounds = array<i64: 1, 32, 32>}, {transform_indices = @transform_7, window_bounds = array<i64: 1, 1, 32>}, {transform_indices = @transform_8, window_bounds = array<i64: 1, 32, 32>}, {transform_indices = @transform_9, window_bounds = array<i64: 1, 1, 32>}, {transform_indices = @transform_10, window_bounds = array<i64: 1, 1, 32>}, {transform_indices = @transform_11, window_bounds = array<i64: 1, 1, 32>}, {transform_indices = @transform_12, window_bounds = array<i64: 1, 32, 64>}, {transform_indices = @transform_13, window_bounds = array<i64: 1, 1, 64>}, {transform_indices = @transform_14, window_bounds = array<i64: 1, 64, 32>}, {transform_indices = @transform_15, window_bounds = array<i64: 1, 1, 32>}, {transform_indices = @transform_16, window_bounds = array<i64: 1, 1, 32>}, {transform_indices = @transform_17, window_bounds = array<i64: 1, 1, 32>}, {pipeline_mode = #tpu.pipeline_mode<synchronous>, transform_indices = @transform_18, window_bounds = array<i64: 32, 128>}, {pipeline_mode = #tpu.pipeline_mode<synchronous>, transform_indices = @transform_19, window_bounds = array<i64: 1, 128>}, {transform_indices = @transform_20, window_bounds = array<i64: 1, 8, 128>}]} {
    %c0_i32 = arith.constant 0 : i32
    %0 = arith.cmpi eq, %arg1, %c0_i32 : i32
    %1 = arith.extui %0 : i1 to i32
    %c0_i32_0 = arith.constant 0 : i32
    %2 = arith.cmpi ne, %1, %c0_i32_0 : i32
    scf.if %2 {
      %c0_75 = arith.constant 0 : index
      %c0_76 = arith.constant 0 : index
      %c0_77 = arith.constant 0 : index
      %173 = vector.load %arg2[%c0_75, %c0_76, %c0_77] : memref<1x8x32xf32, #tpu.memory_space<vmem>>, vector<1x8x32xf32>
      %174 = vector.shape_cast %173 : vector<1x8x32xf32> to vector<8x32xf32>
      %c0_78 = arith.constant 0 : index
      %c0_79 = arith.constant 0 : index
      %175 = vector.load %arg3[%c0_78, %c0_79] : memref<8x32xf32, #tpu.memory_space<vmem>>, vector<8x32xf32>
      %176 = arith.addf %174, %175 : vector<8x32xf32>
      %c0_80 = arith.constant 0 : index
      %c0_81 = arith.constant 0 : index
      %177 = vector.load %arg23[%c0_80, %c0_81] : memref<8x32xf32, #tpu.memory_space<vmem>>, vector<8x32xf32>
      tpu.vector_store %arg23[%c0_80, %c0_81], %176 {strides = array<i32>} : memref<8x32xf32, #tpu.memory_space<vmem>>, vector<8x32xf32>,
    } else {
    }
    %c0 = arith.constant 0 : index
    %c0_1 = arith.constant 0 : index
    %3 = vector.load %arg23[%c0, %c0_1] : memref<8x32xf32, #tpu.memory_space<vmem>>, vector<8x32xf32>
    %4 = arith.truncf %3 : vector<8x32xf32> to vector<8x32xbf16>
    %c0_2 = arith.constant 0 : index
    %c0_3 = arith.constant 0 : index
    %c0_4 = arith.constant 0 : index
    %5 = vector.load %arg4[%c0_2, %c0_3, %c0_4] : memref<1x32x32xbf16, #tpu.memory_space<vmem>>, vector<1x32x32xbf16>
    %6 = vector.shape_cast %5 : vector<1x32x32xbf16> to vector<32x32xbf16>
    %cst = arith.constant dense<0.000000e+00> : vector<8x32xf32>
    %7 = tpu.matmul %4, %6, %cst {dimension_numbers = #tpu.dot_dimension_numbers<[1], [0], [0], [1], [0, 0, 1, 1], [], []>} : vector<8x32xbf16>, vector<32x32xbf16>, vector<8x32xf32> -> vector<8x32xf32>
    %c0_5 = arith.constant 0 : index
    %c0_6 = arith.constant 0 : index
    %c0_7 = arith.constant 0 : index
    %8 = vector.load %arg5[%c0_5, %c0_6, %c0_7] : memref<1x1x32xf32, #tpu.memory_space<vmem>>, vector<1x1x32xf32>
    %9 = vector.shape_cast %8 : vector<1x1x32xf32> to vector<1x32xf32>
    %10 = vector.broadcast %9 : vector<1x32xf32> to vector<8x32xf32>
    %11 = arith.addf %7, %10 : vector<8x32xf32>
    %12 = arith.truncf %3 : vector<8x32xf32> to vector<8x32xbf16>
    %c0_8 = arith.constant 0 : index
    %c0_9 = arith.constant 0 : index
    %c0_10 = arith.constant 0 : index
    %13 = vector.load %arg6[%c0_8, %c0_9, %c0_10] : memref<1x32x32xbf16, #tpu.memory_space<vmem>>, vector<1x32x32xbf16>
    %14 = vector.shape_cast %13 : vector<1x32x32xbf16> to vector<32x32xbf16>
    %cst_11 = arith.constant dense<0.000000e+00> : vector<8x32xf32>
    %15 = tpu.matmul %12, %14, %cst_11 {dimension_numbers = #tpu.dot_dimension_numbers<[1], [0], [0], [1], [0, 0, 1, 1], [], []>} : vector<8x32xbf16>, vector<32x32xbf16>, vector<8x32xf32> -> vector<8x32xf32>
    %c0_12 = arith.constant 0 : index
    %c0_13 = arith.constant 0 : index
    %c0_14 = arith.constant 0 : index
    %16 = vector.load %arg7[%c0_12, %c0_13, %c0_14] : memref<1x1x32xf32, #tpu.memory_space<vmem>>, vector<1x1x32xf32>
    %17 = vector.shape_cast %16 : vector<1x1x32xf32> to vector<1x32xf32>
    %18 = vector.broadcast %17 : vector<1x32xf32> to vector<8x32xf32>
    %19 = arith.addf %15, %18 : vector<8x32xf32>
    %20 = arith.truncf %3 : vector<8x32xf32> to vector<8x32xbf16>
    %c0_15 = arith.constant 0 : index
    %c0_16 = arith.constant 0 : index
    %c0_17 = arith.constant 0 : index
    %21 = vector.load %arg8[%c0_15, %c0_16, %c0_17] : memref<1x32x32xbf16, #tpu.memory_space<vmem>>, vector<1x32x32xbf16>
    %22 = vector.shape_cast %21 : vector<1x32x32xbf16> to vector<32x32xbf16>
    %cst_18 = arith.constant dense<0.000000e+00> : vector<8x32xf32>
    %23 = tpu.matmul %20, %22, %cst_18 {dimension_numbers = #tpu.dot_dimension_numbers<[1], [0], [0], [1], [0, 0, 1, 1], [], []>} : vector<8x32xbf16>, vector<32x32xbf16>, vector<8x32xf32> -> vector<8x32xf32>
    %c0_19 = arith.constant 0 : index
    %c0_20 = arith.constant 0 : index
    %c0_21 = arith.constant 0 : index
    %24 = vector.load %arg9[%c0_19, %c0_20, %c0_21] : memref<1x1x32xf32, #tpu.memory_space<vmem>>, vector<1x1x32xf32>
    %25 = vector.shape_cast %24 : vector<1x1x32xf32> to vector<1x32xf32>
    %26 = vector.broadcast %25 : vector<1x32xf32> to vector<8x32xf32>
    %27 = arith.addf %23, %26 : vector<8x32xf32>
    %28 = vector.extract_strided_slice %11 {offsets = [0, 0], sizes = [8, 8], strides = [1, 1]} : vector<8x32xf32> to vector<8x8xf32>
    %29 = vector.extract_strided_slice %11 {offsets = [0, 8], sizes = [8, 8], strides = [1, 1]} : vector<8x32xf32> to vector<8x8xf32>
    %30 = vector.extract_strided_slice %11 {offsets = [0, 16], sizes = [8, 8], strides = [1, 1]} : vector<8x32xf32> to vector<8x8xf32>
    %31 = vector.extract_strided_slice %11 {offsets = [0, 24], sizes = [8, 8], strides = [1, 1]} : vector<8x32xf32> to vector<8x8xf32>
    %32 = vector.shape_cast %28 : vector<8x8xf32> to vector<1x8x8xf32>
    %33 = vector.shape_cast %29 : vector<8x8xf32> to vector<1x8x8xf32>
    %34 = vector.shape_cast %30 : vector<8x8xf32> to vector<1x8x8xf32>
    %35 = vector.shape_cast %31 : vector<8x8xf32> to vector<1x8x8xf32>
    %36 = tpu.concatenate %32, %33, %34, %35 in 0 : vector<1x8x8xf32>, vector<1x8x8xf32>, vector<1x8x8xf32>, vector<1x8x8xf32> -> vector<4x8x8xf32>
    %37 = arith.truncf %36 : vector<4x8x8xf32> to vector<4x8x8xbf16>
    %38 = vector.extract_strided_slice %19 {offsets = [0, 0], sizes = [8, 8], strides = [1, 1]} : vector<8x32xf32> to vector<8x8xf32>
    %39 = vector.extract_strided_slice %19 {offsets = [0, 8], sizes = [8, 8], strides = [1, 1]} : vector<8x32xf32> to vector<8x8xf32>
    %40 = vector.extract_strided_slice %19 {offsets = [0, 16], sizes = [8, 8], strides = [1, 1]} : vector<8x32xf32> to vector<8x8xf32>
    %41 = vector.extract_strided_slice %19 {offsets = [0, 24], sizes = [8, 8], strides = [1, 1]} : vector<8x32xf32> to vector<8x8xf32>
    %42 = vector.shape_cast %38 : vector<8x8xf32> to vector<1x8x8xf32>
    %43 = vector.shape_cast %39 : vector<8x8xf32> to vector<1x8x8xf32>
    %44 = vector.shape_cast %40 : vector<8x8xf32> to vector<1x8x8xf32>
    %45 = vector.shape_cast %41 : vector<8x8xf32> to vector<1x8x8xf32>
    %46 = tpu.concatenate %42, %43, %44, %45 in 0 : vector<1x8x8xf32>, vector<1x8x8xf32>, vector<1x8x8xf32>, vector<1x8x8xf32> -> vector<4x8x8xf32>
    %47 = arith.truncf %46 : vector<4x8x8xf32> to vector<4x8x8xbf16>
    %48 = vector.extract_strided_slice %27 {offsets = [0, 0], sizes = [8, 8], strides = [1, 1]} : vector<8x32xf32> to vector<8x8xf32>
    %49 = vector.extract_strided_slice %27 {offsets = [0, 8], sizes = [8, 8], strides = [1, 1]} : vector<8x32xf32> to vector<8x8xf32>
    %50 = vector.extract_strided_slice %27 {offsets = [0, 16], sizes = [8, 8], strides = [1, 1]} : vector<8x32xf32> to vector<8x8xf32>
    %51 = vector.extract_strided_slice %27 {offsets = [0, 24], sizes = [8, 8], strides = [1, 1]} : vector<8x32xf32> to vector<8x8xf32>
    %52 = vector.shape_cast %48 : vector<8x8xf32> to vector<1x8x8xf32>
    %53 = vector.shape_cast %49 : vector<8x8xf32> to vector<1x8x8xf32>
    %54 = vector.shape_cast %50 : vector<8x8xf32> to vector<1x8x8xf32>
    %55 = vector.shape_cast %51 : vector<8x8xf32> to vector<1x8x8xf32>
    %56 = tpu.concatenate %52, %53, %54, %55 in 0 : vector<1x8x8xf32>, vector<1x8x8xf32>, vector<1x8x8xf32>, vector<1x8x8xf32> -> vector<4x8x8xf32>
    %57 = arith.truncf %56 : vector<4x8x8xf32> to vector<4x8x8xbf16>
    "tpu.trace_start"() <{level = 10 : i32, message = "hqd,hkd->hqk"}> : () -> ()
    %cst_22 = arith.constant dense<0.000000e+00> : vector<4x8x8xf32>
    %58 = tpu.matmul %37, %47, %cst_22 {dimension_numbers = #tpu.dot_dimension_numbers<[2], [2], [1], [1], [0, 0, 0, 1, 1, 1], [0], [0]>} : vector<4x8x8xbf16>, vector<4x8x8xbf16>, vector<4x8x8xf32> -> vector<4x8x8xf32>
    "tpu.trace_stop"() : () -> ()
    %cst_23 = arith.constant 0.353553385 : f32
    %59 = vector.broadcast %cst_23 : f32 to vector<4x8x8xf32>
    %60 = arith.mulf %58, %59 : vector<4x8x8xf32>
    %61 = tpu.iota {dimensions = array<i32: 0>} : vector<8x8xi32>
    %62 = tpu.iota {dimensions = array<i32: 1>} : vector<8x8xi32>
    %63 = arith.cmpi sle, %62, %61 : vector<8x8xi32>
    %64 = vector.shape_cast %63 : vector<8x8xi1> to vector<1x8x8xi1>
    %cst_24 = arith.constant -1.000000e+09 : f32
    %65 = vector.shape_cast %64 : vector<1x8x8xi1> to vector<1x8x8xi1>
    %66 = vector.broadcast %65 : vector<1x8x8xi1> to vector<4x8x8xi1>
    %67 = vector.broadcast %cst_24 : f32 to vector<4x8x8xf32>
    %68 = arith.select %66, %60, %67 : vector<4x8x8xi1>, vector<4x8x8xf32>
    %cst_25 = arith.constant dense<0xFF800000> : vector<4x8xf32>
    %69 = vector.multi_reduction <maximumf>, %68, %cst_25 [2] : vector<4x8x8xf32> to vector<4x8xf32>
    %70 = vector.shape_cast %69 : vector<4x8xf32> to vector<4x8x1xf32>
    %71 = vector.broadcast %70 : vector<4x8x1xf32> to vector<4x8x8xf32>
    %72 = arith.subf %68, %71 : vector<4x8x8xf32>
    %73 = math.exp %72 : vector<4x8x8xf32>
    %cst_26 = arith.constant dense<0.000000e+00> : vector<4x8xf32>
    %74 = vector.multi_reduction <add>, %73, %cst_26 [2] : vector<4x8x8xf32> to vector<4x8xf32>
    %75 = vector.shape_cast %74 : vector<4x8xf32> to vector<4x8x1xf32>
    %76 = vector.broadcast %75 : vector<4x8x1xf32> to vector<4x8x8xf32>
    %77 = arith.divf %73, %76 : vector<4x8x8xf32>
    %78 = arith.truncf %77 : vector<4x8x8xf32> to vector<4x8x8xbf16>
    "tpu.trace_start"() <{level = 10 : i32, message = "hqk,hkd->hqd"}> : () -> ()
    %cst_27 = arith.constant dense<0.000000e+00> : vector<4x8x8xf32>
    %79 = tpu.matmul %78, %57, %cst_27 {dimension_numbers = #tpu.dot_dimension_numbers<[2], [1], [1], [2], [0, 0, 0, 1, 1, 2], [0], [0]>} : vector<4x8x8xbf16>, vector<4x8x8xbf16>, vector<4x8x8xf32> -> vector<4x8x8xf32>
    "tpu.trace_stop"() : () -> ()
    %80 = vector.extract_strided_slice %79 {offsets = [0, 0, 0], sizes = [1, 8, 8], strides = [1, 1, 1]} : vector<4x8x8xf32> to vector<1x8x8xf32>
    %81 = vector.shape_cast %80 : vector<1x8x8xf32> to vector<8x8xf32>
    %82 = vector.extract_strided_slice %79 {offsets = [1, 0, 0], sizes = [1, 8, 8], strides = [1, 1, 1]} : vector<4x8x8xf32> to vector<1x8x8xf32>
    %83 = vector.shape_cast %82 : vector<1x8x8xf32> to vector<8x8xf32>
    %84 = vector.extract_strided_slice %79 {offsets = [2, 0, 0], sizes = [1, 8, 8], strides = [1, 1, 1]} : vector<4x8x8xf32> to vector<1x8x8xf32>
    %85 = vector.shape_cast %84 : vector<1x8x8xf32> to vector<8x8xf32>
    %86 = vector.extract_strided_slice %79 {offsets = [3, 0, 0], sizes = [1, 8, 8], strides = [1, 1, 1]} : vector<4x8x8xf32> to vector<1x8x8xf32>
    %87 = vector.shape_cast %86 : vector<1x8x8xf32> to vector<8x8xf32>
    %88 = tpu.concatenate %81, %83, %85, %87 in 1 : vector<8x8xf32>, vector<8x8xf32>, vector<8x8xf32>, vector<8x8xf32> -> vector<8x32xf32>
    %89 = arith.truncf %88 : vector<8x32xf32> to vector<8x32xbf16>
    %c0_28 = arith.constant 0 : index
    %c0_29 = arith.constant 0 : index
    %c0_30 = arith.constant 0 : index
    %90 = vector.load %arg10[%c0_28, %c0_29, %c0_30] : memref<1x32x32xbf16, #tpu.memory_space<vmem>>, vector<1x32x32xbf16>
    %91 = vector.shape_cast %90 : vector<1x32x32xbf16> to vector<32x32xbf16>
    %cst_31 = arith.constant dense<0.000000e+00> : vector<8x32xf32>
    %92 = tpu.matmul %89, %91, %cst_31 {dimension_numbers = #tpu.dot_dimension_numbers<[1], [0], [0], [1], [0, 0, 1, 1], [], []>} : vector<8x32xbf16>, vector<32x32xbf16>, vector<8x32xf32> -> vector<8x32xf32>
    %c0_32 = arith.constant 0 : index
    %c0_33 = arith.constant 0 : index
    %c0_34 = arith.constant 0 : index
    %93 = vector.load %arg11[%c0_32, %c0_33, %c0_34] : memref<1x1x32xf32, #tpu.memory_space<vmem>>, vector<1x1x32xf32>
    %94 = vector.shape_cast %93 : vector<1x1x32xf32> to vector<1x32xf32>
    %95 = vector.broadcast %94 : vector<1x32xf32> to vector<8x32xf32>
    %96 = arith.addf %92, %95 : vector<8x32xf32>
    %97 = arith.addf %3, %96 : vector<8x32xf32>
    %c0_35 = arith.constant 0 : index
    %c0_36 = arith.constant 0 : index
    %c0_37 = arith.constant 0 : index
    %98 = vector.load %arg12[%c0_35, %c0_36, %c0_37] : memref<1x1x32xf32, #tpu.memory_space<vmem>>, vector<1x1x32xf32>
    %99 = vector.shape_cast %98 : vector<1x1x32xf32> to vector<1x32xf32>
    %c0_38 = arith.constant 0 : index
    %c0_39 = arith.constant 0 : index
    %c0_40 = arith.constant 0 : index
    %100 = vector.load %arg13[%c0_38, %c0_39, %c0_40] : memref<1x1x32xf32, #tpu.memory_space<vmem>>, vector<1x1x32xf32>
    %101 = vector.shape_cast %100 : vector<1x1x32xf32> to vector<1x32xf32>
    %cst_41 = arith.constant dense<0.000000e+00> : vector<8xf32>
    %102 = vector.multi_reduction <add>, %97, %cst_41 [1] : vector<8x32xf32> to vector<8xf32>
    %103 = vector.shape_cast %102 : vector<8xf32> to vector<8x1xf32>
    %cst_42 = arith.constant 3.200000e+01 : f32
    %104 = vector.broadcast %cst_42 : f32 to vector<8x1xf32>
    %105 = arith.divf %103, %104 : vector<8x1xf32>
    %106 = vector.broadcast %105 : vector<8x1xf32> to vector<8x32xf32>
    %107 = arith.subf %97, %106 : vector<8x32xf32>
    %108 = arith.mulf %107, %107 : vector<8x32xf32>
    %cst_43 = arith.constant dense<0.000000e+00> : vector<8xf32>
    %109 = vector.multi_reduction <add>, %108, %cst_43 [1] : vector<8x32xf32> to vector<8xf32>
    %110 = vector.shape_cast %109 : vector<8xf32> to vector<8x1xf32>
    %cst_44 = arith.constant 3.200000e+01 : f32
    %111 = vector.broadcast %cst_44 : f32 to vector<8x1xf32>
    %112 = arith.divf %110, %111 : vector<8x1xf32>
    %113 = vector.broadcast %105 : vector<8x1xf32> to vector<8x32xf32>
    %114 = arith.subf %97, %113 : vector<8x32xf32>
    %cst_45 = arith.constant 9.99999974E-6 : f32
    %115 = vector.broadcast %cst_45 : f32 to vector<8x1xf32>
    %116 = arith.addf %112, %115 : vector<8x1xf32>
    %117 = math.rsqrt %116 : vector<8x1xf32>
    %118 = vector.broadcast %117 : vector<8x1xf32> to vector<8x32xf32>
    %119 = arith.mulf %114, %118 : vector<8x32xf32>
    %120 = vector.broadcast %99 : vector<1x32xf32> to vector<8x32xf32>
    %121 = arith.mulf %119, %120 : vector<8x32xf32>
    %122 = vector.broadcast %101 : vector<1x32xf32> to vector<8x32xf32>
    %123 = arith.addf %121, %122 : vector<8x32xf32>
    %124 = arith.truncf %123 : vector<8x32xf32> to vector<8x32xbf16>
    %c0_46 = arith.constant 0 : index
    %c0_47 = arith.constant 0 : index
    %c0_48 = arith.constant 0 : index
    %125 = vector.load %arg14[%c0_46, %c0_47, %c0_48] : memref<1x32x64xbf16, #tpu.memory_space<vmem>>, vector<1x32x64xbf16>
    %126 = vector.shape_cast %125 : vector<1x32x64xbf16> to vector<32x64xbf16>
    %cst_49 = arith.constant dense<0.000000e+00> : vector<8x64xf32>
    %127 = tpu.matmul %124, %126, %cst_49 {dimension_numbers = #tpu.dot_dimension_numbers<[1], [0], [0], [1], [0, 0, 1, 1], [], []>} : vector<8x32xbf16>, vector<32x64xbf16>, vector<8x64xf32> -> vector<8x64xf32>
    %c0_50 = arith.constant 0 : index
    %c0_51 = arith.constant 0 : index
    %c0_52 = arith.constant 0 : index
    %128 = vector.load %arg15[%c0_50, %c0_51, %c0_52] : memref<1x1x64xf32, #tpu.memory_space<vmem>>, vector<1x1x64xf32>
    %129 = vector.shape_cast %128 : vector<1x1x64xf32> to vector<1x64xf32>
    %130 = vector.broadcast %129 : vector<1x64xf32> to vector<8x64xf32>
    %131 = arith.addf %127, %130 : vector<8x64xf32>
    %cst_53 = arith.constant 0.000000e+00 : f32
    %132 = vector.broadcast %cst_53 : f32 to vector<8x64xf32>
    %133 = arith.maximumf %131, %132 : vector<8x64xf32>
    %134 = arith.truncf %133 : vector<8x64xf32> to vector<8x64xbf16>
    %c0_54 = arith.constant 0 : index
    %c0_55 = arith.constant 0 : index
    %c0_56 = arith.constant 0 : index
    %135 = vector.load %arg16[%c0_54, %c0_55, %c0_56] : memref<1x64x32xbf16, #tpu.memory_space<vmem>>, vector<1x64x32xbf16>
    %136 = vector.shape_cast %135 : vector<1x64x32xbf16> to vector<64x32xbf16>
    %cst_57 = arith.constant dense<0.000000e+00> : vector<8x32xf32>
    %137 = tpu.matmul %134, %136, %cst_57 {dimension_numbers = #tpu.dot_dimension_numbers<[1], [0], [0], [1], [0, 0, 1, 1], [], []>} : vector<8x64xbf16>, vector<64x32xbf16>, vector<8x32xf32> -> vector<8x32xf32>
    %c0_58 = arith.constant 0 : index
    %c0_59 = arith.constant 0 : index
    %c0_60 = arith.constant 0 : index
    %138 = vector.load %arg17[%c0_58, %c0_59, %c0_60] : memref<1x1x32xf32, #tpu.memory_space<vmem>>, vector<1x1x32xf32>
    %139 = vector.shape_cast %138 : vector<1x1x32xf32> to vector<1x32xf32>
    %140 = vector.broadcast %139 : vector<1x32xf32> to vector<8x32xf32>
    %141 = arith.addf %137, %140 : vector<8x32xf32>
    %142 = arith.addf %123, %141 : vector<8x32xf32>
    %c0_61 = arith.constant 0 : index
    %c0_62 = arith.constant 0 : index
    %c0_63 = arith.constant 0 : index
    %143 = vector.load %arg18[%c0_61, %c0_62, %c0_63] : memref<1x1x32xf32, #tpu.memory_space<vmem>>, vector<1x1x32xf32>
    %144 = vector.shape_cast %143 : vector<1x1x32xf32> to vector<1x32xf32>
    %c0_64 = arith.constant 0 : index
    %c0_65 = arith.constant 0 : index
    %c0_66 = arith.constant 0 : index
    %145 = vector.load %arg19[%c0_64, %c0_65, %c0_66] : memref<1x1x32xf32, #tpu.memory_space<vmem>>, vector<1x1x32xf32>
    %146 = vector.shape_cast %145 : vector<1x1x32xf32> to vector<1x32xf32>
    %cst_67 = arith.constant dense<0.000000e+00> : vector<8xf32>
    %147 = vector.multi_reduction <add>, %142, %cst_67 [1] : vector<8x32xf32> to vector<8xf32>
    %148 = vector.shape_cast %147 : vector<8xf32> to vector<8x1xf32>
    %cst_68 = arith.constant 3.200000e+01 : f32
    %149 = vector.broadcast %cst_68 : f32 to vector<8x1xf32>
    %150 = arith.divf %148, %149 : vector<8x1xf32>
    %151 = vector.broadcast %150 : vector<8x1xf32> to vector<8x32xf32>
    %152 = arith.subf %142, %151 : vector<8x32xf32>
    %153 = arith.mulf %152, %152 : vector<8x32xf32>
    %cst_69 = arith.constant dense<0.000000e+00> : vector<8xf32>
    %154 = vector.multi_reduction <add>, %153, %cst_69 [1] : vector<8x32xf32> to vector<8xf32>
    %155 = vector.shape_cast %154 : vector<8xf32> to vector<8x1xf32>
    %cst_70 = arith.constant 3.200000e+01 : f32
    %156 = vector.broadcast %cst_70 : f32 to vector<8x1xf32>
    %157 = arith.divf %155, %156 : vector<8x1xf32>
    %158 = vector.broadcast %150 : vector<8x1xf32> to vector<8x32xf32>
    %159 = arith.subf %142, %158 : vector<8x32xf32>
    %cst_71 = arith.constant 9.99999974E-6 : f32
    %160 = vector.broadcast %cst_71 : f32 to vector<8x1xf32>
    %161 = arith.addf %157, %160 : vector<8x1xf32>
    %162 = math.rsqrt %161 : vector<8x1xf32>
    %163 = vector.broadcast %162 : vector<8x1xf32> to vector<8x32xf32>
    %164 = arith.mulf %159, %163 : vector<8x32xf32>
    %165 = vector.broadcast %144 : vector<1x32xf32> to vector<8x32xf32>
    %166 = arith.mulf %164, %165 : vector<8x32xf32>
    %167 = vector.broadcast %146 : vector<1x32xf32> to vector<8x32xf32>
    %168 = arith.addf %166, %167 : vector<8x32xf32>
    %c0_72 = arith.constant 0 : index
    %c0_73 = arith.constant 0 : index
    %169 = vector.load %arg23[%c0_72, %c0_73] : memref<8x32xf32, #tpu.memory_space<vmem>>, vector<8x32xf32>
    tpu.vector_store %arg23[%c0_72, %c0_73], %168 {strides = array<i32>} : memref<8x32xf32, #tpu.memory_space<vmem>>, vector<8x32xf32>,
    %c1_i32 = arith.constant 1 : i32
    %170 = arith.cmpi eq, %arg1, %c1_i32 : i32
    %171 = arith.extui %170 : i1 to i32
    %c0_i32_74 = arith.constant 0 : i32
    %172 = arith.cmpi ne, %171, %c0_i32_74 : i32
    scf.if %172 {
      %173 = arith.truncf %168 : vector<8x32xf32> to vector<8x32xbf16>
      %c0_75 = arith.constant 0 : index
      %c0_76 = arith.constant 0 : index
      %174 = vector.load %arg20[%c0_75, %c0_76] : memref<32x128xbf16, #tpu.memory_space<vmem>>, vector<32x128xbf16>
      %cst_77 = arith.constant dense<0.000000e+00> : vector<8x128xf32>
      %175 = tpu.matmul %173, %174, %cst_77 {dimension_numbers = #tpu.dot_dimension_numbers<[1], [0], [0], [1], [0, 0, 1, 1], [], []>} : vector<8x32xbf16>, vector<32x128xbf16>, vector<8x128xf32> -> vector<8x128xf32>
      %c0_78 = arith.constant 0 : index
      %c0_79 = arith.constant 0 : index
      %176 = vector.load %arg21[%c0_78, %c0_79] : memref<1x128xf32, #tpu.memory_space<vmem>>, vector<1x128xf32>
      %177 = vector.broadcast %176 : vector<1x128xf32> to vector<8x128xf32>
      %178 = arith.addf %175, %177 : vector<8x128xf32>
      %c0_80 = arith.constant 0 : index
      %c0_81 = arith.constant 0 : index
      %c0_82 = arith.constant 0 : index
      %179 = vector.load %arg22[%c0_80, %c0_81, %c0_82] : memref<1x8x128xf32, #tpu.memory_space<vmem>>, vector<1x8x128xf32>
      %180 = vector.shape_cast %179 : vector<1x8x128xf32> to vector<8x128xf32>
      %181 = vector.shape_cast %178 : vector<8x128xf32> to vector<1x8x128xf32>
      tpu.vector_store %arg22[%c0_80, %c0_81, %c0_82], %181 {strides = array<i32>} : memref<1x8x128xf32, #tpu.memory_space<vmem>>, vector<1x8x128xf32>,
    } else {
    }
    return
  }
  func.func @transform_0(%arg0: i32, %arg1: i32) -> (i32, i32, i32) {
    %c0_i32 = arith.constant 0 : i32
    %c0_i32_0 = arith.constant 0 : i32
    %c0_i32_1 = arith.constant 0 : i32
    return %arg0, %c0_i32, %c0_i32_0 : i32, i32, i32
  }
  func.func @transform_1(%arg0: i32, %arg1: i32) -> (i32, i32) {
    %c0_i32 = arith.constant 0 : i32
    %c0_i32_0 = arith.constant 0 : i32
    %c0_i32_1 = arith.constant 0 : i32
    return %c0_i32, %c0_i32_0 : i32, i32
  }
  func.func @transform_2(%arg0: i32, %arg1: i32) -> (i32, i32, i32) {
    %c0_i32 = arith.constant 0 : i32
    %c0_i32_0 = arith.constant 0 : i32
    %c0_i32_1 = arith.constant 0 : i32
    return %arg1, %c0_i32, %c0_i32_0 : i32, i32, i32
  }
  func.func @transform_3(%arg0: i32, %arg1: i32) -> (i32, i32, i32) {
    %c0_i32 = arith.constant 0 : i32
    %c0_i32_0 = arith.constant 0 : i32
    %c0_i32_1 = arith.constant 0 : i32
    return %arg1, %c0_i32, %c0_i32_0 : i32, i32, i32
  }
  func.func @transform_4(%arg0: i32, %arg1: i32) -> (i32, i32, i32) {
    %c0_i32 = arith.constant 0 : i32
    %c0_i32_0 = arith.constant 0 : i32
    %c0_i32_1 = arith.constant 0 : i32
    return %arg1, %c0_i32, %c0_i32_0 : i32, i32, i32
  }
  func.func @transform_5(%arg0: i32, %arg1: i32) -> (i32, i32, i32) {
    %c0_i32 = arith.constant 0 : i32
    %c0_i32_0 = arith.constant 0 : i32
    %c0_i32_1 = arith.constant 0 : i32
    return %arg1, %c0_i32, %c0_i32_0 : i32, i32, i32
  }
  func.func @transform_6(%arg0: i32, %arg1: i32) -> (i32, i32, i32) {
    %c0_i32 = arith.constant 0 : i32
    %c0_i32_0 = arith.constant 0 : i32
    %c0_i32_1 = arith.constant 0 : i32
    return %arg1, %c0_i32, %c0_i32_0 : i32, i32, i32
  }
  func.func @transform_7(%arg0: i32, %arg1: i32) -> (i32, i32, i32) {
    %c0_i32 = arith.constant 0 : i32
    %c0_i32_0 = arith.constant 0 : i32
    %c0_i32_1 = arith.constant 0 : i32
    return %arg1, %c0_i32, %c0_i32_0 : i32, i32, i32
  }
  func.func @transform_8(%arg0: i32, %arg1: i32) -> (i32, i32, i32) {
    %c0_i32 = arith.constant 0 : i32
    %c0_i32_0 = arith.constant 0 : i32
    %c0_i32_1 = arith.constant 0 : i32
    return %arg1, %c0_i32, %c0_i32_0 : i32, i32, i32
  }
  func.func @transform_9(%arg0: i32, %arg1: i32) -> (i32, i32, i32) {
    %c0_i32 = arith.constant 0 : i32
    %c0_i32_0 = arith.constant 0 : i32
    %c0_i32_1 = arith.constant 0 : i32
    return %arg1, %c0_i32, %c0_i32_0 : i32, i32, i32
  }
  func.func @transform_10(%arg0: i32, %arg1: i32) -> (i32, i32, i32) {
    %c0_i32 = arith.constant 0 : i32
    %c0_i32_0 = arith.constant 0 : i32
    %c0_i32_1 = arith.constant 0 : i32
    return %arg1, %c0_i32, %c0_i32_0 : i32, i32, i32
  }
  func.func @transform_11(%arg0: i32, %arg1: i32) -> (i32, i32, i32) {
    %c0_i32 = arith.constant 0 : i32
    %c0_i32_0 = arith.constant 0 : i32
    %c0_i32_1 = arith.constant 0 : i32
    return %arg1, %c0_i32, %c0_i32_0 : i32, i32, i32
  }
  func.func @transform_12(%arg0: i32, %arg1: i32) -> (i32, i32, i32) {
    %c0_i32 = arith.constant 0 : i32
    %c0_i32_0 = arith.constant 0 : i32
    %c0_i32_1 = arith.constant 0 : i32
    return %arg1, %c0_i32, %c0_i32_0 : i32, i32, i32
  }
  func.func @transform_13(%arg0: i32, %arg1: i32) -> (i32, i32, i32) {
    %c0_i32 = arith.constant 0 : i32
    %c0_i32_0 = arith.constant 0 : i32
    %c0_i32_1 = arith.constant 0 : i32
    return %arg1, %c0_i32, %c0_i32_0 : i32, i32, i32
  }
  func.func @transform_14(%arg0: i32, %arg1: i32) -> (i32, i32, i32) {
    %c0_i32 = arith.constant 0 : i32
    %c0_i32_0 = arith.constant 0 : i32
    %c0_i32_1 = arith.constant 0 : i32
    return %arg1, %c0_i32, %c0_i32_0 : i32, i32, i32
  }
  func.func @transform_15(%arg0: i32, %arg1: i32) -> (i32, i32, i32) {
    %c0_i32 = arith.constant 0 : i32
    %c0_i32_0 = arith.constant 0 : i32
    %c0_i32_1 = arith.constant 0 : i32
    return %arg1, %c0_i32, %c0_i32_0 : i32, i32, i32
  }
  func.func @transform_16(%arg0: i32, %arg1: i32) -> (i32, i32, i32) {
    %c0_i32 = arith.constant 0 : i32
    %c0_i32_0 = arith.constant 0 : i32
    %c0_i32_1 = arith.constant 0 : i32
    return %arg1, %c0_i32, %c0_i32_0 : i32, i32, i32
  }
  func.func @transform_17(%arg0: i32, %arg1: i32) -> (i32, i32, i32) {
    %c0_i32 = arith.constant 0 : i32
    %c0_i32_0 = arith.constant 0 : i32
    %c0_i32_1 = arith.constant 0 : i32
    return %arg1, %c0_i32, %c0_i32_0 : i32, i32, i32
  }
  func.func @transform_18(%arg0: i32, %arg1: i32) -> (i32, i32) {
    %c0_i32 = arith.constant 0 : i32
    %c0_i32_0 = arith.constant 0 : i32
    %c0_i32_1 = arith.constant 0 : i32
    return %c0_i32, %c0_i32_0 : i32, i32
  }
  func.func @transform_19(%arg0: i32, %arg1: i32) -> (i32, i32) {
    %c0_i32 = arith.constant 0 : i32
    %c0_i32_0 = arith.constant 0 : i32
    %c0_i32_1 = arith.constant 0 : i32
    return %c0_i32, %c0_i32_0 : i32, i32
  }
  func.func @transform_20(%arg0: i32, %arg1: i32) -> (i32, i32, i32) {
    %c0_i32 = arith.constant 0 : i32
    %c0_i32_0 = arith.constant 0 : i32
    %c0_i32_1 = arith.constant 0 : i32
    return %arg0, %c0_i32, %c0_i32_0 : i32, i32, i32
  }
}

</mosaic_0001>

<bundles_post_ra>
// kernel: tpu_custom_call.1
= control target key start
LH: loop header
LB: loop body
LE: loop exit
PB: predicated region body
PF: predicated region fallthrough
CT: control target
= control target key end

     0   :  { %s4122_s0 = inlined_call_operand.hbm [shape: f32[2,8,32], index: 0, kind: input, shape index: {}]   ;;  %s4123_s1 = inlined_call_operand.hbm [shape: f32[8,32], index: 1, kind: input, shape index: {}]   ;;  %s4124_s2 = inlined_call_operand.vmem [shape: bf16[2,32,32], index: 2, kind: input, shape index: {}]   ;;  %s4125_s3 = inlined_call_operand.vmem [shape: f32[2,1,32], index: 3, kind: input, shape index: {}]   ;;  %s4126_s4 = inlined_call_operand.vmem [shape: bf16[2,32,32], index: 4, kind: input, shape index: {}]   ;;  %s4127_s5 = inlined_call_operand.hbm [shape: f32[2,1,32], index: 5, kind: input, shape index: {}]   ;;  %s4128_s6 = inlined_call_operand.vmem [shape: bf16[2,32,32], index: 6, kind: input, shape index: {}]   ;;  %s4129_s7 = inlined_call_operand.vmem [shape: f32[2,1,32], index: 7, kind: input, shape index: {}]   ;;  %s4130_s8 = inlined_call_operand.hbm [shape: bf16[2,32,32], index: 8, kind: input, shape index: {}]   ;;  %s4131_s9 = inlined_call_operand.hbm [shape: f32[2,1,32], index: 9, kind: input, shape index: {}]   ;;  %s4132_s10 = inlined_call_operand.hbm [shape: f32[2,1,32], index: 10, kind: input, shape index: {}]   ;;  %s4133_s11 = inlined_call_operand.hbm [shape: f32[2,1,32], index: 11, kind: input, shape index: {}]   ;;  %s4134_s12 = inlined_call_operand.hbm [shape: bf16[2,32,64], index: 12, kind: input, shape index: {}]   ;;  %s4135_s13 = inlined_call_operand.hbm [shape: f32[2,1,64], index: 13, kind: input, shape index: {}]   ;;  %s4136_s14 = inlined_call_operand.vmem [shape: bf16[2,64,32], index: 14, kind: input, shape index: {}]   ;;  %s4137_s15 = inlined_call_operand.vmem [shape: f32[2,1,32], index: 15, kind: input, shape index: {}]   ;;  %s4138_s16 = inlined_call_operand.vmem [shape: f32[2,1,32], index: 16, kind: input, shape index: {}]   ;;  %s4139_s17 = inlined_call_operand.vmem [shape: f32[2,1,32], index: 17, kind: input, shape index: {}]   ;;  %s4140_s18 = inlined_call_operand.vmem [shape: bf16[32,128], index: 18, kind: input, shape index: {}]   ;;  %s4141_s19 = inlined_call_operand.vmem [shape: f32[1,128], index: 19, kind: input, shape index: {}]   ;;  %s4142_s20 = inlined_call_operand.hbm [shape: f32[2,8,128], index: 20, kind: output, shape index: {}]  }
   0x1   :  { %4178 = sst [smem:[#allocation34_spill]] %s4122_s0 }
   0x2   :  { %4179 = sst [smem:[#allocation35_spill]] %s4123_s1 }
   0x3   :  { %4180 = sst [smem:[#allocation36_spill]] %s4124_s2 }
   0x4   :  { %4181 = sst [smem:[#allocation37_spill]] %s4125_s3 }
   0x5   :  { %4182 = sst [smem:[#allocation38_spill]] %s4126_s4 }
   0x6   :  { %4183 = sst [smem:[#allocation39_spill]] %s4127_s5 }
   0x7   :  { %4184 = sst [smem:[#allocation40_spill]] %s4128_s6 }
   0x8   :  { %4185 = sst [smem:[#allocation41_spill]] %s4129_s7 }
   0x9   :  { %4186 = sst [smem:[#allocation42_spill]] %s4130_s8 }
   0xa   :  { %4187 = sst [smem:[#allocation43_spill]] %s4131_s9 }
   0xb   :  { %4188 = sst [smem:[#allocation44_spill]] %s4132_s10 }
   0xc   :  { %4189 = sst [smem:[#allocation45_spill]] %s4133_s11 }
   0xd   :  { %4190 = sst [smem:[#allocation46_spill]] %s4134_s12 }
   0xe   :  { %4191 = sst [smem:[#allocation47_spill]] %s4135_s13 }
   0xf   :  { %4192 = sst [smem:[#allocation48_spill]] %s4136_s14 }
  0x10   :  { %4193 = sst [smem:[#allocation49_spill]] %s4137_s15 }
  0x11   :  { %4194 = sst [smem:[#allocation50_spill]] %s4138_s16 }
  0x12   :  { %4195 = sst [smem:[#allocation51_spill]] %s4139_s17 }
  0x13   :  { %4196 = sst [smem:[#allocation52_spill]] %s4140_s18 }
  0x14   :  { %4197 = sst [smem:[#allocation53_spill]] %s4141_s19 }
  0x15   :  { %4198 = sst [smem:[#allocation54_spill]] %s4142_s20 }
  0x16   :  { %25 = vsyncpa [#allocation4], 0 }
  0x17   :  { %27 = vsyncpa [#allocation4 + $0x1], 0 }
  0x18   :  { %28 = vsyncpa [#allocation7], 0 }
  0x19   :  { %29 = vsyncpa [#allocation5], 0 }
  0x1a   :  { %31 = vsyncpa [#allocation5 + $0x1], 0  ;;  %s3378_s1 = smov 0   ;;  %s3380_s22 = smov 0  }
  0x1b   :  { %s3382_s23 = smov 0   ;;  %s3384_s24 = smov 0  }
  0x1c   :  { %s3386_s2 = smov 0   ;;  %s3388_s25 = smov 0  }
  0x1d   :  { %s3390_s3 = smov 0   ;;  %s3392_s26 = smov 0  }
  0x1e   :  { %s3394_s27 = smov 0   ;;  %s3396_s28 = smov 0  }
  0x1f   :  { %s3398_s4 = smov 0  }
  0x20 LB: > { %4199 = sst [smem:[#allocation20_spill]] %s3213_s22  ;;  %s46_s29 = sadd.s32 1, %s3241_s27  ;;  %s3249_s4 = sphi %s3398_s4, %s37_s4   ;;  %s3245_s28 = sphi %s3396_s28, %s4288_s28   ;;  %s3241_s27 = sphi %s3394_s27, %s4287_s27   ;;  %s3237_s26 = sphi %s3392_s26, %s4286_s26   ;;  %s3233_s3 = sphi %s3390_s3, %s4285_s3   ;;  %s3229_s25 = sphi %s3388_s25, %s4284_s25   ;;  %s3225_s2 = sphi %s3386_s2, %s4290_s2   ;;  %s3221_s24 = sphi %s3384_s24, %s4289_s24   ;;  %s3217_s23 = sphi %s3382_s23, %s4282_s23   ;;  %s3213_s22 = sphi %s3380_s22, %s4281_s22   ;;  %s3209_s1 = sphi %s3378_s1, %s4280_s1  }
  0x21   : > { %4200 = sst [smem:[#allocation21_spill]] %s3217_s23  ;;  %s49_s30 = sadd.s32 1, %s3245_s28 }
  0x22   : > { %4201 = sst [smem:[#allocation22_spill]] %s3221_s24  ;;  %p47_p0 = scmp.ge.s32.totalorder %s46_s29, 2 }
  0x23   : > { %4202 = sst [smem:[#allocation23_spill]] %s3229_s25  ;;  %s56_s0 = sadd.s32 1, %s3229_s25 }
  0x24   : > { %4203 = sst [smem:[#allocation24_spill]] %s3233_s3  ;;  %p4151_p1 = scmp.ne.s32.totalorder %s3229_s25, %s3225_s2 }
  0x25   : > { %4204 = sst [smem:[#allocation25_spill]] %s3237_s26  ;;  %p64_p2 = scmp.eq.s32.totalorder %s3249_s4, 0 }
  0x26   : > { %4205 = sst [smem:[#allocation26_spill]] %s3241_s27  ;;  %s4292_s29 = smov (%p47_p0, %s46_s29), 0 }
  0x27   : > { %4206 = sst [smem:[#allocation27_spill]] %s3245_s28  ;;  %s4294_s30 = smov (!%p47_p0, %s49_s30), %s3245_s28 }
  0x28   : > { %4207 = sst [smem:[#allocation28_spill]] %s3249_s4  ;;  %p3445_p3 = por %p64_p2, %p4151_p1 }
  0x29   : > { %4208 = sst [smem:[#allocation29_spill]] %s4292_s29  ;;  %s178_s20 = ssub.s32 %s3241_s27, %s4292_s29 }
  0x2a   : > { %p51_p4 = scmp.ge.s32.totalorder %s4294_s30, 2  ;;  %p179_p5 = scmp.eq.s32.totalorder %s178_s20, 0 }
  0x2b   : > { %s181_s26 = sadd.s32 1, %s3217_s23  ;;  %p188_p6 = scmp.ne.s32.totalorder %s3217_s23, %s3213_s22 }
  0x2c   : > { %s4296_s30 = smov (%p51_p4, %s4294_s30), 0  ;;  %p2711_p9 = scmp.lt.s32.totalorder %s3249_s4, 4 }
  0x2d   : > { %4210 = sst [smem:[#allocation30_spill]] %s4296_s30  ;;  %s53_s18 = ssub.s32 %s3245_s28, %s4296_s30 }
  0x2e   : > { %s3457_s19 = scalar_select %p179_p5, %s3217_s23, %s181_s26  }
  0x2f   : > { %p3461_p7 = por %p188_p6, %p64_p2  ;;  %p54_p8 = scmp.eq.s32.totalorder %s53_s18, 0 }
  0x30   : > { %4211 = sst [smem:[#allocation31_spill]] %s3457_s19  ;;  %s615_s29 = sand.u32 1, %s3249_s4  }
  0x31   : > { %s3468_s16 = scalar_select %p54_p8, %s3229_s25, %s56_s0  }
  0x32   : > { %s617_s20 = sand.u32 1, %s3229_s25   ;;  %s2428_s15 = sshll.u32 %s3245_s28, 7 }
  0x33   : > { %4213 = sst [smem:[#allocation32_spill]] %s3468_s16  ;;  %s2427_s14 = sshll.u32 %s617_s20, 3 }
  0x34   : > { %s4214_s3 = sld [smem:[#allocation34_spill]]  ;;  %s619_s30 = scalar_lea.vmem [#allocation3], %s2427_s14 }
  0x35   : > { %s626_s19 = sshll.u32 %s619_s30, 4  ;;  %p3479_p10 = pnand %p2711_p9, %p3445_p3  ;;  %s3483_s19 = int_to_ptr.vmem [resolvable:$true] %s626_s19 }
  0x36   : > { %p3487_p11 = pnand %p2711_p9, %p3461_p7  ;;  %s3492_s7 = sand.u32 1, %s3217_s23  }
  0x37   : > { %p2853_p13 = pneg %p3479_p10 }
  0x38   : > { %s4217_s6 = scalar_select %p3487_p11, 1, 0 }
  0x3a   : > { %s4215_s13 = smov %s4214_s3  ;;  %s3475_s26 = scalar_lea.hbm %s4214_s3, %s2428_s15 }
  0x3b   : > { %s3494_s15 = scalar_lea.sflag [#allocation4], %s615_s29  ;;  %s2851_s14 = scalar_lea.hbm %s3475_s26, 128 }
  0x3c   : > { %p2852_p12 = scmp.ne.s32.totalorder %s3475_s26, %s2851_s14  ;;  %s2856_s17 = scalar_lea.hbm %s4215_s13, 256 }
  0x3d   : > { %p2857_p3 = scmp.lt.u32.totalorder %s3475_s26, %s4215_s13  ;;  %p2858_p4 = scmp.lt.u32.totalorder %s2856_s17, %s2851_s14 }
  0x3e   : > { %p2854_p0 = pnand %p2853_p13, %p2852_p12  ;;  %p2860_p6 = scmp.lt.u32.totalorder %s2851_s14, %s3475_s26 }
  0x3f   : > { %p2859_p5 = por %p2858_p4, %p2857_p3 }
  0x40   : > { %p2855_p2 = pneg %p2854_p0 }
  0x41   : > { %p2861_p7 = por %p2860_p6, %p2859_p5 }
  0x43   : > { %p2862_p8 = pnand %p2861_p7, %p2855_p2 }
  0x45   : > { %2865 = shalt.err (!%p2862_p8)
}
  0x46   : > { %s2866_s29 = scalar_lea.vmem %s3483_s19, 128  ;;  %s3251_s20 = smov [#allocation3]  }
  0x47   : > { %p2867_p9 = scmp.ne.s32.totalorder %s3483_s19, %s2866_s29  ;;  %s2871_s3 = sshll.u32 %s3251_s20, 4  ;;  %s2872_s3 = int_to_ptr.vmem [resolvable:$false] %s2871_s3 }
  0x48   : > { %s2873_s30 = scalar_lea.vmem %s2872_s3, 256  ;;  %p2874_p1 = scmp.lt.s32.totalorder %s3483_s19, %s2872_s3 }
  0x49   : > { %p2869_p12 = pnand %p2867_p9, %p2853_p13  ;;  %p2875_p3 = scmp.lt.s32.totalorder %s2873_s30, %s2866_s29 }
  0x4b   : > { %p2870_p0 = pneg %p2869_p12  ;;  %p2876_p4 = por %p2875_p3, %p2874_p1 }
  0x4d   : > { %p2877_p5 = pnand %p2876_p4, %p2870_p0 }
  0x4f   : > { %2880 = shalt.err (!%p2877_p5)
}
  0x50   : > { %2684 = dma.hbm_to_vmem [thread:$0]  (!%p3479_p10), %s3475_s26, 128, %s3483_s19, %s3494_s15  }
  0x51   : > { %s3523_s14 = sshll.u32 %s3241_s27, 4  ;;  %s658_s17 = scalar_lea.vmem [#allocation8], %s3492_s7 }
  0x52   : > { %s665_s0 = sshll.u32 %s658_s17, 4  ;;  %s4218_s5 = sld [smem:[#allocation39_spill]]  ;;  %s666_s0 = int_to_ptr.vmem [resolvable:$true] %s665_s0 }
  0x53   : > { %p3536_p13 = pneg %p3487_p11 }
  0x58   : > { %s3530_s29 = scalar_lea.hbm %s4218_s5, %s3523_s14  ;;  %s2886_s30 = scalar_lea.hbm %s4218_s5, 32 }
  0x59   : > { %s2881_s18 = scalar_lea.hbm %s3530_s29, 16  ;;  %p2887_p6 = scmp.lt.u32.totalorder %s3530_s29, %s4218_s5 }
  0x5a   : > { %p2882_p1 = scmp.ne.s32.totalorder %s3530_s29, %s2881_s18  ;;  %p2888_p7 = scmp.lt.u32.totalorder %s2886_s30, %s2881_s18 }
  0x5b   : > { %p2890_p9 = scmp.lt.u32.totalorder %s2881_s18, %s3530_s29 }
  0x5c   : > { %p2884_p10 = pnand %p3536_p13, %p2882_p1  ;;  %p2889_p8 = por %p2888_p7, %p2887_p6 }
  0x5e   : > { %p2885_p2 = pneg %p2884_p10  ;;  %p2891_p12 = por %p2890_p9, %p2889_p8 }
  0x60   : > { %p2892_p0 = pnand %p2891_p12, %p2885_p2 }
  0x62   : > { %2895 = shalt.err (!%p2892_p0)
}
  0x63   : > { %s2896_s20 = scalar_lea.vmem %s666_s0, 16  ;;  %s3252_s13 = smov [#allocation8]  }
  0x64   : > { %p2897_p3 = scmp.ne.s32.totalorder %s666_s0, %s2896_s20  ;;  %s2901_s28 = sshll.u32 %s3252_s13, 4  ;;  %s2902_s28 = int_to_ptr.vmem [resolvable:$false] %s2901_s28 }
  0x65   : > { %s2903_s26 = scalar_lea.vmem %s2902_s28, 32  ;;  %p2904_p1 = scmp.lt.s32.totalorder %s666_s0, %s2902_s28 }
  0x66   : > { %p2899_p4 = pnand %p2897_p3, %p3536_p13  ;;  %p2905_p10 = scmp.lt.s32.totalorder %s2903_s26, %s2896_s20 }
  0x68   : > { %p2900_p5 = pneg %p2899_p4  ;;  %p2906_p11 = por %p2905_p10, %p2904_p1 }
  0x6a   : > { %p2907_p6 = pnand %p2906_p11, %p2900_p5 }
  0x6c   : > { %2910 = shalt.err (!%p2907_p6)
}
  0x6d   : > { %p4220_p7 = scmp.ne.s32.totalorder %s4217_s6, 0  ;;  %s4156_s18 = sshll.u32 %s3492_s7, 4 }
  0x6e   : > { %s4157_s3 = sshll.u32 %s3241_s27, 8  ;;  %s4221_s8 = sld [smem:[#allocation42_spill]] }
  0x6f   : > { %2687 = dma.hbm_to_vmem [thread:$0]  (!%p4220_p7), %s3530_s29, 16, %s666_s0, %s3494_s15  }
  0x70   : > { %s690_s17 = scalar_lea.vmem [#allocation9], %s4156_s18 }
  0x71   : > { %s697_s21 = sshll.u32 %s690_s17, 4  ;;  %s3567_s21 = int_to_ptr.vmem [resolvable:$true] %s697_s21 }
  0x74   : > { %s3563_s28 = scalar_lea.hbm %s4221_s8, %s4157_s3  ;;  %s2916_s26 = scalar_lea.hbm %s4221_s8, 512 }
  0x75   : > { %s2911_s20 = scalar_lea.hbm %s3563_s28, 256  ;;  %p2917_p9 = scmp.lt.u32.totalorder %s3563_s28, %s4221_s8 }
  0x76   : > { %p2912_p11 = scmp.ne.s32.totalorder %s3563_s28, %s2911_s20  ;;  %p2918_p12 = scmp.lt.u32.totalorder %s2916_s26, %s2911_s20 }
  0x77   : > { %p2920_p3 = scmp.lt.u32.totalorder %s2911_s20, %s3563_s28 }
  0x78   : > { %p2914_p2 = pnand %p2912_p11, %p3536_p13  ;;  %p2919_p0 = por %p2918_p12, %p2917_p9 }
  0x7a   : > { %p2915_p8 = pneg %p2914_p2  ;;  %p2921_p4 = por %p2920_p3, %p2919_p0 }
  0x7c   : > { %p2922_p5 = pnand %p2921_p4, %p2915_p8 }
  0x7e   : > { %2925 = shalt.err (!%p2922_p5)
}
  0x7f   : > { %s2926_s17 = scalar_lea.vmem %s3567_s21, 256  ;;  %s3253_s0 = smov [#allocation9]  }
  0x80   : > { %p2927_p1 = scmp.ne.s32.totalorder %s3567_s21, %s2926_s17  ;;  %s2931_s29 = sshll.u32 %s3253_s0, 4  ;;  %s2932_s29 = int_to_ptr.vmem [resolvable:$false] %s2931_s29 }
  0x81   : > { %s2933_s13 = scalar_lea.vmem %s2932_s29, 512  ;;  %p2934_p11 = scmp.lt.s32.totalorder %s3567_s21, %s2932_s29 }
  0x82   : > { %p2929_p10 = pnand %p2927_p1, %p3536_p13  ;;  %p2935_p2 = scmp.lt.s32.totalorder %s2933_s13, %s2926_s17 }
  0x84   : > { %p2930_p6 = pneg %p2929_p10  ;;  %p2936_p9 = por %p2935_p2, %p2934_p11 }
  0x86   : > { %p2937_p12 = pnand %p2936_p9, %p2930_p6 }
  0x88   : > { %2940 = shalt.err (!%p2937_p12)
}
  0x89   : > { %s4158_s20 = smov 64   ;;  %s4160_s26 = smov 4  }
  0x8a   : > { %2690 = dma.hbm_to_vmem [thread:$0]  (!%p4220_p7), %s3563_s28, 256, %s3567_s21, %s3494_s15, %s4158_s20, %s4158_s20, %s4160_s26  }
  0x8b   : > { %s4222_s9 = sld [smem:[#allocation43_spill]]  ;;  %s710_s29 = scalar_lea.vmem [#allocation10], %s3492_s7 }
  0x8c   : > { %s717_s13 = sshll.u32 %s710_s29, 4  ;;  %s4223_s10 = sld [smem:[#allocation44_spill]]  ;;  %s718_s13 = int_to_ptr.vmem [resolvable:$true] %s717_s13 }
  0x91   : > { %s3598_s0 = scalar_lea.hbm %s4222_s9, %s3523_s14  ;;  %s2946_s30 = scalar_lea.hbm %s4222_s9, 32 }
  0x92   : > { %s3605_s5 = scalar_lea.hbm %s4223_s10, %s3523_s14  ;;  %s2941_s8 = scalar_lea.hbm %s3598_s0, 16 }
  0x93   : > { %p2942_p8 = scmp.ne.s32.totalorder %s3598_s0, %s2941_s8  ;;  %p2947_p4 = scmp.lt.u32.totalorder %s3598_s0, %s4222_s9 }
  0x94   : > { %p2948_p5 = scmp.lt.u32.totalorder %s2946_s30, %s2941_s8  ;;  %p2950_p10 = scmp.lt.u32.totalorder %s2941_s8, %s3598_s0 }
  0x95   : > { %p2944_p0 = pnand %p2942_p8, %p3536_p13 }
  0x96   : > { %p2949_p1 = por %p2948_p5, %p2947_p4 }
  0x97   : > { %p2945_p3 = pneg %p2944_p0 }
  0x98   : > { %p2951_p6 = por %p2950_p10, %p2949_p1 }
  0x9a   : > { %p2952_p11 = pnand %p2951_p6, %p2945_p3 }
  0x9c   : > { %2955 = shalt.err (!%p2952_p11)
}
  0x9d   : > { %s2956_s18 = scalar_lea.vmem %s718_s13, 16  ;;  %s3256_s3 = smov [#allocation10]  }
  0x9e   : > { %p2957_p2 = scmp.ne.s32.totalorder %s718_s13, %s2956_s18  ;;  %s2961_s29 = sshll.u32 %s3256_s3, 4  ;;  %s2962_s29 = int_to_ptr.vmem [resolvable:$false] %s2961_s29 }
  0x9f   : > { %s2963_s28 = scalar_lea.vmem %s2962_s29, 32  ;;  %p2964_p8 = scmp.lt.s32.totalorder %s718_s13, %s2962_s29 }
  0xa0   : > { %p2959_p9 = pnand %p2957_p2, %p3536_p13  ;;  %p2965_p0 = scmp.lt.s32.totalorder %s2963_s28, %s2956_s18 }
  0xa2   : > { %p2960_p12 = pneg %p2959_p9  ;;  %p2966_p7 = por %p2965_p0, %p2964_p8 }
  0xa4   : > { %p2967_p4 = pnand %p2966_p7, %p2960_p12 }
  0xa6   : > { %2970 = shalt.err (!%p2967_p4)
}
  0xa7   : > { %p4224_p5 = scmp.ne.s32.totalorder %s4217_s6, 0  ;;  %s727_s8 = scalar_lea.vmem [#allocation11], %s3492_s7 }
  0xa8   : > { %s734_s20 = sshll.u32 %s727_s8, 4  ;;  %s4225_s11 = sld [smem:[#allocation45_spill]]  ;;  %s735_s20 = int_to_ptr.vmem [resolvable:$true] %s734_s20 }
  0xa9   : > { %2693 = dma.hbm_to_vmem [thread:$0]  (!%p4224_p5), %s3598_s0, 16, %s718_s13, %s3494_s15  }
  0xaa   : > { %s2971_s18 = scalar_lea.hbm %s3605_s5, 16  ;;  %s2976_s28 = scalar_lea.hbm %s4223_s10, 32 }
  0xab   : > { %p2972_p7 = scmp.ne.s32.totalorder %s3605_s5, %s2971_s18  ;;  %p2977_p10 = scmp.lt.u32.totalorder %s3605_s5, %s4223_s10 }
  0xac   : > { %p2978_p6 = scmp.lt.u32.totalorder %s2976_s28, %s2971_s18  ;;  %p2980_p2 = scmp.lt.u32.totalorder %s2971_s18, %s3605_s5 }
  0xad   : > { %p2974_p3 = pnand %p2972_p7, %p3536_p13 }
  0xae   : > { %s3630_s17 = scalar_lea.hbm %s4225_s11, %s3523_s14  ;;  %p2979_p11 = por %p2978_p6, %p2977_p10 }
  0xaf   : > { %p2975_p1 = pneg %p2974_p3 }
  0xb0   : > { %p2981_p9 = por %p2980_p2, %p2979_p11 }
  0xb2   : > { %p2982_p12 = pnand %p2981_p9, %p2975_p1 }
  0xb4   : > { %2985 = shalt.err (!%p2982_p12)
}
  0xb5   : > { %s2986_s0 = scalar_lea.vmem %s735_s20, 16  ;;  %s3257_s13 = smov [#allocation11]  }
  0xb6   : > { %p2987_p8 = scmp.ne.s32.totalorder %s735_s20, %s2986_s0  ;;  %s2991_s8 = sshll.u32 %s3257_s13, 4  ;;  %s2992_s8 = int_to_ptr.vmem [resolvable:$false] %s2991_s8 }
  0xb7   : > { %s2993_s21 = scalar_lea.vmem %s2992_s8, 32  ;;  %p2994_p7 = scmp.lt.s32.totalorder %s735_s20, %s2992_s8 }
  0xb8   : > { %p2989_p0 = pnand %p2987_p8, %p3536_p13  ;;  %p2995_p3 = scmp.lt.s32.totalorder %s2993_s21, %s2986_s0 }
  0xba   : > { %p2990_p4 = pneg %p2989_p0  ;;  %p2996_p5 = por %p2995_p3, %p2994_p7 }
  0xbc   : > { %p2997_p6 = pnand %p2996_p5, %p2990_p4 }
  0xbe   : > { %3000 = shalt.err (!%p2997_p6)
}
  0xbf   : > { %p4226_p10 = scmp.ne.s32.totalorder %s4217_s6, 0  ;;  %s744_s9 = scalar_lea.vmem [#allocation12], %s3492_s7 }
  0xc0   : > { %s751_s26 = sshll.u32 %s744_s9, 4  ;;  %s4227_s30 = sshll.u32 %s3241_s27, 8  ;;  %s752_s26 = int_to_ptr.vmem [resolvable:$true] %s751_s26 }
  0xc1   : > { %2696 = dma.hbm_to_vmem [thread:$0]  (!%p4226_p10), %s3605_s5, 16, %s735_s20, %s3494_s15  }
  0xc2   : > { %s4228_s12 = sld [smem:[#allocation46_spill]]  ;;  %s3001_s28 = scalar_lea.hbm %s3630_s17, 16 }
  0xc3   : > { %p3002_p5 = scmp.ne.s32.totalorder %s3630_s17, %s3001_s28  ;;  %s3006_s8 = scalar_lea.hbm %s4225_s11, 32 }
  0xc4   : > { %p3007_p2 = scmp.lt.u32.totalorder %s3630_s17, %s4225_s11  ;;  %p3008_p9 = scmp.lt.u32.totalorder %s3006_s8, %s3001_s28 }
  0xc5   : > { %p3004_p1 = pnand %p3002_p5, %p3536_p13  ;;  %p3010_p8 = scmp.lt.u32.totalorder %s3001_s28, %s3630_s17 }
  0xc6   : > { %p3009_p12 = por %p3008_p9, %p3007_p2 }
  0xc7   : > { %p3005_p11 = pneg %p3004_p1 }
  0xc8   : > { %s3656_s29 = scalar_lea.hbm %s4228_s12, %s4227_s30  ;;  %p3011_p0 = por %p3010_p8, %p3009_p12 }
  0xca   : > { %p3012_p4 = pnand %p3011_p0, %p3005_p11 }
  0xcc   : > { %3015 = shalt.err (!%p3012_p4)
}
  0xcd   : > { %s3016_s20 = scalar_lea.vmem %s752_s26, 16  ;;  %s3258_s9 = smov [#allocation12]  }
  0xce   : > { %p3017_p7 = scmp.ne.s32.totalorder %s752_s26, %s3016_s20  ;;  %s3021_s30 = sshll.u32 %s3258_s9, 4  ;;  %s3022_s30 = int_to_ptr.vmem [resolvable:$false] %s3021_s30 }
  0xcf   : > { %s3023_s18 = scalar_lea.vmem %s3022_s30, 32  ;;  %p3024_p5 = scmp.lt.s32.totalorder %s752_s26, %s3022_s30 }
  0xd0   : > { %p3019_p3 = pnand %p3017_p7, %p3536_p13  ;;  %p3025_p1 = scmp.lt.s32.totalorder %s3023_s18, %s3016_s20 }
  0xd2   : > { %p3020_p6 = pneg %p3019_p3  ;;  %p3026_p10 = por %p3025_p1, %p3024_p5 }
  0xd4   : > { %p3027_p2 = pnand %p3026_p10, %p3020_p6 }
  0xd6   : > { %3030 = shalt.err (!%p3027_p2)
}
  0xd7   : > { %p4229_p9 = scmp.ne.s32.totalorder %s4217_s6, 0  ;;  %s4230_s3 = sshll.u32 %s3492_s7, 4 }
  0xd8   : > { %s762_s28 = scalar_lea.vmem [#allocation13], %s4230_s3  ;;  %s3031_s13 = scalar_lea.hbm %s3656_s29, 256 }
  0xd9   : > { %2699 = dma.hbm_to_vmem [thread:$0]  (!%p4229_p9), %s3630_s17, 16, %s752_s26, %s3494_s15  }
  0xda   : > { %s769_s0 = sshll.u32 %s762_s28, 4  ;;  %p3032_p11 = scmp.ne.s32.totalorder %s3656_s29, %s3031_s13  ;;  %s3678_s0 = int_to_ptr.vmem [resolvable:$true] %s769_s0 }
  0xdb   : > { %s3036_s5 = scalar_lea.hbm %s4228_s12, 512  ;;  %p3037_p8 = scmp.lt.u32.totalorder %s3656_s29, %s4228_s12 }
  0xdc   : > { %p3034_p10 = pnand %p3032_p11, %p3536_p13  ;;  %p3038_p0 = scmp.lt.u32.totalorder %s3036_s5, %s3031_s13 }
  0xdd   : > { %p3040_p7 = scmp.lt.u32.totalorder %s3031_s13, %s3656_s29 }
  0xde   : > { %p3035_p12 = pneg %p3034_p10  ;;  %p3039_p4 = por %p3038_p0, %p3037_p8 }
  0xe0   : > { %p3041_p3 = por %p3040_p7, %p3039_p4 }
  0xe2   : > { %p3042_p6 = pnand %p3041_p3, %p3035_p12 }
  0xe4   : > { %3045 = shalt.err (!%p3042_p6)
}
  0xe5   : > { %s3046_s17 = scalar_lea.vmem %s3678_s0, 256  ;;  %s3259_s26 = smov [#allocation13]  }
  0xe6   : > { %p3047_p5 = scmp.ne.s32.totalorder %s3678_s0, %s3046_s17  ;;  %s3051_s30 = sshll.u32 %s3259_s26, 4  ;;  %s3052_s30 = int_to_ptr.vmem [resolvable:$false] %s3051_s30 }
  0xe7   : > { %s3053_s18 = scalar_lea.vmem %s3052_s30, 512  ;;  %p3054_p11 = scmp.lt.s32.totalorder %s3678_s0, %s3052_s30 }
  0xe8   : > { %p3049_p1 = pnand %p3047_p5, %p3536_p13  ;;  %p3055_p10 = scmp.lt.s32.totalorder %s3053_s18, %s3046_s17 }
  0xea   : > { %p3050_p2 = pneg %p3049_p1  ;;  %p3056_p8 = por %p3055_p10, %p3054_p11 }
  0xec   : > { %p3057_p0 = pnand %p3056_p8, %p3050_p2 }
  0xee   : > { %3060 = shalt.err (!%p3057_p0)
}
  0xef   : > { %s4231_s3 = smov 4   ;;  %s4232_s28 = smov 64  }
  0xf0   : > { %2702 = dma.hbm_to_vmem [thread:$0]  (!%p4229_p9), %s3656_s29, 256, %s3678_s0, %s3494_s15, %s4232_s28, %s4232_s28, %s4231_s3  }
  0xf1   : > { %s3706_s13 = sadd.s32 4294967295, %s3249_s4   ;;  %s2423_s8 = sadd.s32 4294967294, %s3249_s4  }
  0xf2   : > { %p69_p12 = scmp.ne.s32.totalorder %s3225_s2, %s3221_s24  ;;  %p4163_p4 = scmp.eq.s32.totalorder %s3706_s13, 0 }
  0xf3   : > { %p194_p7 = scmp.ne.s32.totalorder %s3213_s22, %s3209_s1  ;;  %p572_p3 = scmp.eq.s32.totalorder %s3706_s13, 3 }
  0xf4   : > { %p3717_p6 = por %p4163_p4, %p69_p12  ;;  %p578_p5 = scmp.eq.s32.totalorder %s2423_s8, 3 }
  0xf5   : > { %p3723_p1 = por %p194_p7, %p4163_p4  ;;  %p4235_p2 = scmp.ne.s32.totalorder %s3229_s25, %s3225_s2 }
  0xf6   : > { %s4233_s21 = scalar_select %p3717_p6, 1, 0 }
  0xf7   : > { %s4234_s29 = scalar_select %p3723_p1, 1, 0 }
  0xf8   : > { %p3730_p11 = por %p572_p3, %p4235_p2  ;;  %p3734_p10 = por %p578_p5, %p69_p12 }
  0xf9   : > { %p2424_p8 = scmp.ge.s32.totalorder %s3249_s4, 1  ;;  %p585_p0 = scmp.lt.s32.totalorder %s3249_s4, 5 }
  0xfa   : > { %s4236_s0 = scalar_select %p3730_p11, 1, 0 }
  0xfb   : > { %s4237_s1 = scalar_select %p3734_p10, 1, 0 }
  0xfc   : > { %p3740_p6 = pnand %p2424_p8, %p585_p0  ;;  %s3260_s20 = smov [#allocation6]  }
  0xfd   : > { %4238 = sst [smem:[#allocation33_spill]] %s4237_s1  ;;  %s598_s9 = sshll.u32 %s3260_s20, 4  ;;  %s3755_s9 = int_to_ptr.vmem [resolvable:$true] %s598_s9 }
  0xfe   : > { %s4239_s5 = scalar_select %p3740_p6, 1, 0 }
  0xff   : > { %s4240_s30 = sld [smem:[#allocation47_spill]]  ;;  %p2677_p12 = pneg %p3740_p6 }
 0x100   : > { %s782_s3 = scalar_lea.vmem [#allocation14], %s3492_s7 }
 0x101   : > { %s789_s28 = sshll.u32 %s782_s3, 4  ;;  %p3759_p7 = pnand %p2677_p12, %p4163_p4  ;;  %s3753_s28 = int_to_ptr.vmem [resolvable:$true] %s789_s28 }
 0x103   : > { %s4241_s8 = scalar_select %p3759_p7, 1, 0 }
 0x105   : > { %s3748_s18 = scalar_lea.hbm %s4240_s30, %s3523_s14  ;;  %s3066_s26 = scalar_lea.hbm %s4240_s30, 32 }
 0x106   : > { %s3061_s20 = scalar_lea.hbm %s3748_s18, 16  ;;  %p3067_p8 = scmp.lt.u32.totalorder %s3748_s18, %s4240_s30 }
 0x107   : > { %p3062_p3 = scmp.ne.s32.totalorder %s3748_s18, %s3061_s20  ;;  %p3068_p0 = scmp.lt.u32.totalorder %s3066_s26, %s3061_s20 }
 0x108   : > { %p3070_p11 = scmp.lt.u32.totalorder %s3061_s20, %s3748_s18 }
 0x109   : > { %p3064_p5 = pnand %p3062_p3, %p3536_p13  ;;  %p3069_p10 = por %p3068_p0, %p3067_p8 }
 0x10b   : > { %p3065_p2 = pneg %p3064_p5  ;;  %p3071_p12 = por %p3070_p11, %p3069_p10 }
 0x10d   : > { %p3072_p4 = pnand %p3071_p12, %p3065_p2 }
 0x10f   : > { %3075 = shalt.err (!%p3072_p4)
}
 0x110   : > { %s3076_s10 = scalar_lea.vmem %s3753_s28, 16  ;;  %s3261_s14 = smov [#allocation14]  }
 0x111   : > { %p3077_p3 = scmp.ne.s32.totalorder %s3753_s28, %s3076_s10  ;;  %s3081_s17 = sshll.u32 %s3261_s14, 4  ;;  %s3082_s17 = int_to_ptr.vmem [resolvable:$false] %s3081_s17 }
 0x112   : > { %s3083_s7 = scalar_lea.vmem %s3082_s17, 32  ;;  %p3084_p6 = scmp.lt.s32.totalorder %s3753_s28, %s3082_s17 }
 0x113   : > { %p3079_p5 = pnand %p3077_p3, %p3536_p13  ;;  %p3085_p7 = scmp.lt.s32.totalorder %s3083_s7, %s3076_s10 }
 0x115   : > { %p3080_p1 = pneg %p3079_p5  ;;  %p3086_p8 = por %p3085_p7, %p3084_p6 }
 0x117   : > { %p3087_p0 = pnand %p3086_p8, %p3080_p1 }
 0x119   : > { %3090 = shalt.err (!%p3087_p0)
}
 0x11a   : > { %2705 = dma.hbm_to_vmem [thread:$0]  (!%p4229_p9), %s3748_s18, 16, %s3753_s28, %s3494_s15  }
 0x11b   : > { %s4242_s26 = sld [smem:[#allocation35_spill]]  ;;  %p4244_p4 = scmp.ne.s32.totalorder %s4241_s8, 0 }
 0x11d   : > { %p3093_p11 = pneg %p4244_p4 }
 0x121   : > { %s4243_s11 = smov %s4242_s26  ;;  %s3091_s3 = scalar_lea.hbm %s4242_s26, 128 }
 0x122   : > { %p3092_p13 = scmp.ne.s32.totalorder %s4243_s11, %s3091_s3  ;;  %p3098_p10 = scmp.lt.u32.totalorder %s3091_s3, %s4243_s11 }
 0x124   : > { %p3094_p6 = pnand %p3093_p11, %p3092_p13 }
 0x126   : > { %p3095_p1 = pneg %p3094_p6 }
 0x128   : > { %p3100_p7 = pnand %p3098_p10, %p3095_p1 }
 0x12a   : > { %3103 = shalt.err (!%p3100_p7)
}
 0x12b   : > { %s3104_s6 = scalar_lea.vmem %s3755_s9, 128  ;;  %p3112_p3 = scmp.lt.s32.totalorder %s3755_s9, %s3755_s9 }
 0x12c   : > { %p3105_p9 = scmp.ne.s32.totalorder %s3755_s9, %s3104_s6  ;;  %p3113_p5 = scmp.lt.s32.totalorder %s3104_s6, %s3104_s6 }
 0x12e   : > { %p3107_p2 = pnand %p3105_p9, %p3093_p11  ;;  %p3114_p8 = por %p3113_p5, %p3112_p3 }
 0x130   : > { %p3108_p12 = pneg %p3107_p2 }
 0x132   : > { %p3115_p0 = pnand %p3114_p8, %p3108_p12 }
 0x134   : > { %3118 = shalt.err (!%p3115_p0)
}
 0x135   : > { %2680 = dma.hbm_to_vmem [thread:$0]  (!%p4244_p4), %s4243_s11, 128, %s3755_s9, [#allocation7]  }
 0x136   : > { %p4245_p13 = scmp.ne.s32.totalorder %s4239_s5, 0 }
 0x137   : > { %s826_s18 = sand.u32 (!%p4245_p13), 1, %s3706_s13   ;;  %s4167_s28 = sand.u32 (!%p4245_p13), 1, %s3225_s2  }
 0x138   : > { %824 = sbr.rel (%p4245_p13) target bundleno = 3088 (0xc10), region = 100  ;;  %s3812_s7 = sshll.u32 (!%p4245_p13), %s4167_s28, 3 }
 0x139   : > { %s827_s20 = scalar_lea.sflag (!%p4245_p13), [#allocation4], %s826_s18  ;;  %p4246_p11 = scmp.ne.s32.totalorder (!%p4245_p13), %s4233_s21, 0 }
 0x13f   : > { %3192 = dma.done.wait (%p4246_p11), %s827_s20, 128  }
 0x140   : > { %3194 = vsyncadd (%p4246_p11), %s827_s20, 4294967168  ;;  %p4247_p4 = scmp.eq.s32.totalorder %s3706_s13, 0 }
 0x142   : > { %3196 = dma.done.wait (%p4247_p4), [#allocation7], 128   ;;  %p4248_p6 = pmov %p4247_p4 }
 0x143   : > { %s3824_s5 = sand.u32 1, %s3213_s22   ;;  %p4249_p1 = scmp.ne.s32.totalorder %s4234_s29, 0 }
 0x144   : > { %3198 = vsyncadd (%p4248_p6), [#allocation7], 4294967168 }
 0x145   : > { %3200 = dma.done.wait (%p4249_p1), %s827_s20, 592  }
 0x146   : > { %3202 = vsyncadd (%p4249_p1), %s827_s20, 4294966704  ;;  %s4250_s21 = sld [smem:[#allocation24_spill]]  ;;  %s2443_s19 = sshll.u32 %s3824_s5, 4 }
 0x147   : > { %s4252_s12 = sld [smem:[#allocation36_spill]]  ;;  %s4253_s28 = sld [smem:[#allocation38_spill]] }
 0x148   : > { %s4254_s30 = sld [smem:[#allocation40_spill]]  ;;  %s4256_s17 = sld [smem:[#allocation49_spill]] }
 0x149   : > { %s4257_s1 = sld [smem:[#allocation48_spill]]  ;;  %s4258_s24 = sld [smem:[#allocation50_spill]] }
 0x14a   : > { %s3876_s16 = scalar_lea.vmem [#allocation9], %s2443_s19  ;;  %s859_s25 = scalar_lea.vmem [#allocation10], %s3824_s5 }
 0x14b   : > { %s867_s29 = scalar_lea.vmem [#allocation11], %s3824_s5  ;;  %s875_s3 = scalar_lea.vmem [#allocation12], %s3824_s5 }
 0x14c   : > { %p1014_p10 = scmp.lt.s32.totalorder %s4250_s21, 1  ;;  %s3881_s23 = scalar_lea.vmem [#allocation13], %s2443_s19 }
 0x14d   : > { %s892_s10 = scalar_lea.vmem [#allocation14], %s3824_s5  ;;  %p2454_p7 = scmp.ne.s32.totalorder %s4250_s21, 0 }
 0x14e   : > { %s3834_s13 = scalar_select %p1014_p10, %s4250_s21, 1 }
 0x14f   : > { %s4260_s22 = scalar_lea.vmem (!%p2454_p7), [#allocation3], %s3812_s7  ;;  %v1055_v1 = vld [vmem:[#allocation6] sm:$0xff] (!%p2454_p7)  ;;  %vm1057_vm0 = vcmask (!%p2454_p7), 261120  }
 0x150   : > { %s2504_s26 = sshll.u32 %s3834_s13, 4  ;;  %s2507_s14 = sshll.u32 %s3834_s13, 5  ;;  %v1054_v0 = vld [vmem:[%s4260_s22] sm:$0xff] (!%p2454_p7) }
 0x151   : > { %s1018_s15 = scalar_lea.vmem %s4252_s12, %s2504_s26  ;;  %s3847_s9 = scalar_lea.vmem %s4253_s28, %s2504_s26  ;;  %v1056_v2 = vadd.f32 (!%p2454_p7), %v1055_v1, %v1054_v0 }
 0x152   : > { %s3852_s27 = scalar_lea.vmem %s4254_s30, %s2504_s26  ;;  %s1042_s6 = scalar_lea.vmem %s4256_s17, %s3834_s13 }
 0x153   : > { %s3866_s18 = scalar_lea.vmem %s4257_s1, %s2507_s14  ;;  %s1045_s11 = scalar_lea.vmem %s4258_s24, %s3834_s13  ;;  %1058 = vst.msk [vmem:[#allocation2] sm:$0xff] (!%p2454_p7), %vm1057_vm0, %v1056_v2 }
 0x154   : > { %s4259_s26 = sld [smem:[#allocation51_spill]]  ;;  %s1013_s17 = scalar_lea.vmem [#allocation15], %s3812_s7 }
 0x155   : > { %1053 = sbr.rel (%p2454_p7) target bundleno = 348 (0x15c), region = 140 }
 0x15a   : > { %s1048_s4 = scalar_lea.vmem %s4259_s26, %s3834_s13 }
 0x15c PF: > { %v2815_v3 = vld [vmem:[%s1018_s15] sm:$0xff]   ;;  %v3262_v4 = vmov 0.0   ;;  %v2817_v6 = vld [vmem:[%s1018_s15 + $0x8] sm:$0xff]   ;;  %vm3263_vm1 = vmmov 0   ;;  %vm1084_vm2 = vcmask 261120   ;;  %s4263_s19 = scalar_lea.vmem [#allocation8], %s3824_s5  ;;  %v1485_v50 = vlaneseq }
 0x15d   : > { %2547 = vmatprep.subr.bf16.mxu0 %v3262_v4  ;;  %2555 = vmatprep.subr.bf16.mxu1 %v3262_v4  ;;  %v2816_v5 = vld [vmem:[%s3847_s9] sm:$0xff]   ;;  %v2818_v7 = vld [vmem:[%s3847_s9 + $0x8] sm:$0xff]   ;;  %s4261_s9 = sld [smem:[#allocation37_spill]]  ;;  %vm1296_vm3 = vcmask 64512   ;;  %s3265_s15 = smov 104   ;;  %vm1547_vm4 = vcmask 1043456  }
 0x15e   : > { %2548 = vmatpush3.bf16.msra.mxu0 %v2815_v3  ;;  %2551 = vmatprep.mubr.msk.bf16.mxu0 %vm3263_vm1, %v3262_v4  ;;  %v3898_v8 = vld [vmem:[#allocation2] sm:$0xff]  ;;  %v2820_v11 = vld [vmem:[%s3852_s27 + $0x8] sm:$0xff]   ;;  %s3266_s14 = smov 112   ;;  %s4264_s20 = sld [smem:[#allocation41_spill]]  ;;  %v1486_v51 = vshrl.u32 %v1485_v50, 7  ;;  %v1488_v52 = vand.u32 127, %v1485_v50 }
 0x15f   : > { %2556 = vmatpush3.bf16.msra.mxu1 %v2816_v5  ;;  %2549 = vmatprep.subr.bf16.mxu0 %v3262_v4  ;;  %v1060_v9 = vpack.c.bf16 %v3898_v8, %v3898_v8  ;;  %v2819_v10 = vld [vmem:[%s3852_s27] sm:$0xff]   ;;  %s3264_s27 = smov 120   ;;  %s3267_s8 = smov 8   ;;  %vm1742_vm6 = vcmask 130048   ;;  %vm1744_vm7 = vcmask 195584   ;;  %vm1952_vm8 = vcmask 523264  }
 0x160   : > { %2557 = vmatprep.subr.bf16.mxu1 %v3262_v4  ;;  %2559 = vmatprep.mubr.msk.bf16.mxu1 %vm3263_vm1, %v3262_v4  ;;  %v2459_v13 = vld [vmem:[%s4263_s19] ss:$0 sm:$0xff]  ;;  %vm1489_vm5 = vcmp.le.s32.totalorder %v1488_v52, %v1486_v51  ;;  %s3268_s26 = smov 16   ;;  %s3269_s22 = smov 24  }
 0x161   : > { %s4269_s24 = sld [smem:[#allocation24_spill]] }
 0x162   : > { %2550 = vmatpush3.bf16.msra.mxu0 %v2817_v6 }
 0x163   : > { %2558 = vmatpush3.bf16.msra.mxu1 %v2818_v7  ;;  %2563 = vmatprep.subr.bf16.mxu0 %v3262_v4  ;;  %s4262_s21 = scalar_lea.vmem %s4261_s9, %s3834_s13 }
 0x164   : > { %2571 = vmatprep.subr.bf16.mxu1 %v3262_v4  ;;  %v2455_v12 = vld [vmem:[%s4262_s21] ss:$0 sm:$0xff]  ;;  %s4265_s30 = scalar_lea.vmem %s4264_s20, %s3834_s13 }
 0x165   : > { %2552 = vmatmul.mubr.msk.bf16.vlgmr.msra.gmra.mrb[0].mxu0 %vm1084_vm2, %v1060_v9  ;;  %v2463_v34 = vld [vmem:[%s4265_s30] ss:$0 sm:$0xff] }
 0x166   : > { %2560 = vmatmul.mubr.msk.bf16.vlgmr.msra.gmra.mrb[0].mxu1 %vm1084_vm2, %v1060_v9  ;;  %2567 = vmatprep.mubr.msk.bf16.mxu0 %vm3263_vm1, %v3262_v4 }
 0x167   : > { %2573 = vmatprep.mubr.msk.bf16.mxu1 %vm3263_vm1, %v3262_v4  ;;  %2564 = vmatpush3.bf16.msra.mxu0 %v2819_v10  ;;  %p2493_p9 = scmp.ne.s32.totalorder %s4269_s24, 1 }
 0x168   : > { %2565 = vmatprep.subr.bf16.mxu0 %v3262_v4  ;;  %s4270_s21 = sld [smem:[#allocation52_spill]] (!%p2493_p9)  ;;  %vm3271_vm9 = vmmov (!%p2493_p9), 0  }
 0x16b   : > { %2566 = vmatpush3.bf16.msra.mxu0 %v2820_v11 }
 0x16c   : > { %2577 = vmatprep.subr.bf16.mxu0 %v3262_v4 }
 0x16e   : > { %2568 = vmatmul.mubr.msk.bf16.vlgmr.msra.gmra.mrb[4].mxu0 %vm1084_vm2, %v1060_v9 }
 0x16f   : > { %2579 = vmatprep.mubr.msk.bf16.mxu0 %vm3263_vm1, %v3262_v4 }
 0x238   : > { %v1122_v14 = vpop.f32.mrb[0].mxu0 }
 0x239   : > { %v1123_v15 = vadd.f32 %v2455_v12, %v1122_v14  ;;  %v1185_v16 = vpop.f32.mrb[0].mxu1  ;;  %v2553_v17 = vpop.f32.mrb[1].mxu0 }
 0x23a   : > { %v1186_v18 = vadd.f32 %v2459_v13, %v1185_v16  ;;  %v2561_v19 = vpop.f32.mrb[1].mxu1  ;;  %v1125_v20 = vpop.f32.mrb[2].mxu0 }
 0x23b   : > { %v1188_v21 = vpop.f32.mrb[2].mxu1  ;;  %1255 = vrot.lane.b32.xlu1 %v1123_v15, %s3264_s27  ;;  %v2554_v22 = vpop.f32.mrb[3].mxu0  ;;  %v1264_v26 = vpack.c.bf16 %v1123_v15, %v1123_v15 }
 0x23c   : > { %1269 = vrot.lane.b32.xlu0 %v1186_v18, %s3264_s27  ;;  %v2562_v23 = vpop.f32.mrb[3].mxu1  ;;  %v1278_v24 = vpack.c.bf16 %v1186_v18, %v1186_v18 }
 0x23e   : > { %v1301_v25 = vsel %vm1296_vm3, %v1278_v24, 0 }
 0x23f   : > { %2572 = vmatpush3.bf16.xpose.msra.mxu1 %v1301_v25  ;;  %1275 = vrot.lane.b32.xlu1 %v1186_v18, %s3265_s15 }
 0x240   : > { %1272 = vrot.lane.b32.xlu0 %v1186_v18, %s3266_s14  ;;  %2583 = vmatprep.subr.bf16.mxu1 %v3262_v4 }
 0x241   : > { %v1248_v27 = vpop.f32.mrb[4].mxu0 }
 0x242   : > { %v2569_v28 = vpop.f32.mrb[5].mxu0  ;;  %v3942_v39 = vadd.f32 %v2463_v34, %v1248_v27 }
 0x243   : > { %1261 = vrot.lane.b32.xlu1 %v1123_v15, %s3265_s15  ;;  %v1251_v29 = vpop.f32.mrb[6].mxu0 }
 0x244   : > { %1258 = vrot.lane.b32.xlu0 %v1123_v15, %s3266_s14  ;;  %v2570_v30 = vpop.f32.mrb[7].mxu0  ;;  %v1292_v43 = vpack.c.bf16 %v3942_v39, %v3942_v39 }
 0x246   : > { %2574 = vmatmul.mubr.msk.bf16.vlgmr.msra.gmra.mrb[4].mxu1 %vm1296_vm3, %v1264_v26  ;;  %v1549_v47 = vsel %vm1547_vm4, %v1292_v43, 0 }
 0x247   : > { %2585 = vmatprep.mubr.msk.bf16.mxu1 %vm3263_vm1, %v3262_v4 }
 0x2ad   : > { %v1256_v31 = vpop.permute.xlu1 %1255 }
 0x2ae   : > { %v1270_v32 = vpop.permute.xlu0 %1269  ;;  %v1265_v42 = vpack.c.bf16 %v1256_v31, %v1256_v31 }
 0x2af   : > { %v1279_v33 = vpack.c.bf16 %v1270_v32, %v1270_v32 }
 0x2b1   : > { %v1347_v35 = vsel %vm1296_vm3, %v1279_v33, 0  ;;  %v1276_v37 = vpop.permute.xlu1 %1275 }
 0x2b2   : > { %v1273_v36 = vpop.permute.xlu0 %1272  ;;  %2578 = vmatpush3.bf16.xpose.msra.mxu0 %v1347_v35  ;;  %v1281_v41 = vpack.c.bf16 %v1276_v37, %v1276_v37 }
 0x2b3   : > { %v1280_v38 = vpack.c.bf16 %v1273_v36, %v1273_v36  ;;  %2589 = vmatprep.subr.bf16.mxu0 %v3262_v4 }
 0x2b4   : > { %v1439_v45 = vsel %vm1296_vm3, %v1281_v41, 0 }
 0x2b5   : > { %v1393_v40 = vsel %vm1296_vm3, %v1280_v38, 0  ;;  %v1262_v48 = vpop.permute.xlu1 %1261 }
 0x2b6   : > { %2584 = vmatpush3.bf16.xpose.msra.mxu1 %v1393_v40  ;;  %v1259_v44 = vpop.permute.xlu0 %1258  ;;  %v1267_v49 = vpack.c.bf16 %v1262_v48, %v1262_v48 }
 0x2b7   : > { %2595 = vmatprep.subr.bf16.mxu1 %v3262_v4  ;;  %v1266_v46 = vpack.c.bf16 %v1259_v44, %v1259_v44 }
 0x2b9   : > { %2580 = vmatmul.mubr.msk.bf16.vlgmr.msra.gmra.mrb[8].mxu0 %vm1296_vm3, %v1265_v42 }
 0x2ba   : > { %2590 = vmatpush3.bf16.xpose.msra.mxu0 %v1439_v45  ;;  %2591 = vmatprep.mubr.msk.bf16.mxu0 %vm3263_vm1, %v3262_v4 }
 0x2bb   : > { %2601 = vmatprep.subr.bf16.mxu0 %v3262_v4 }
 0x2bd   : > { %2586 = vmatmul.mubr.msk.bf16.vlgmr.msra.gmra.mrb[8].mxu1 %vm1296_vm3, %v1266_v46 }
 0x2be   : > { %2596 = vmatpush3.bf16.msra.mxu1 %v1549_v47  ;;  %2597 = vmatprep.mubr.msk.bf16.mxu1 %vm3263_vm1, %v3262_v4 }
 0x2bf   : > { %2607 = vmatprep.subr.bf16.mxu1 %v3262_v4 }
 0x2c1   : > { %2592 = vmatmul.mubr.msk.bf16.vlgmr.msra.gmra.mrb[12].mxu0 %vm1296_vm3, %v1267_v49 }
 0x2c2   : > { %2603 = vmatprep.mubr.msk.bf16.mxu0 %vm3263_vm1, %v3262_v4 }
 0x319   : > { %v1337_v53 = vpop.f32.mrb[4].mxu1 }
 0x31a   : > { %v1481_v54 = vmul.f32 0.35355338, %v1337_v53  ;;  %v2575_v55 = vpop.f32.mrb[5].mxu1 }
 0x31b   : > { %v1340_v56 = vpop.f32.mrb[6].mxu1 }
 0x31c   : > { %v2576_v57 = vpop.f32.mrb[7].mxu1  ;;  %v1492_v58 = vsel %vm1489_vm5, %v1481_v54, -1e+09 }
 0x31d   : > { %v1496_v59 = vsel %vm1296_vm3, %v1492_v58, -inf }
 0x31e   : > { %1497 = vmax.xlane.f32.xlu0 %v1496_v59 }
 0x38c   : > { %v1383_v60 = vpop.f32.mrb[8].mxu0 }
 0x38d   : > { %v1482_v61 = vmul.f32 0.35355338, %v1383_v60  ;;  %v2581_v62 = vpop.f32.mrb[9].mxu0 }
 0x38e   : > { %v1386_v63 = vpop.f32.mrb[10].mxu0 }
 0x38f   : > { %v2582_v0 = vpop.f32.mrb[11].mxu0  ;;  %v1493_v1 = vsel %vm1489_vm5, %v1482_v61, -1e+09 }
 0x390   : > { %v1429_v2 = vpop.f32.mrb[8].mxu1  ;;  %v1499_v3 = vsel %vm1296_vm3, %v1493_v1, -inf }
 0x391   : > { %v1483_v5 = vmul.f32 0.35355338, %v1429_v2  ;;  %v2587_v6 = vpop.f32.mrb[9].mxu1  ;;  %1500 = vmax.xlane.f32.xlu1 %v1499_v3 }
 0x392   : > { %v1432_v7 = vpop.f32.mrb[10].mxu1  ;;  %v2822_v6 = vld [vmem:[%s3876_s16 + $0x8] sm:$0xff]  }
 0x393   : > { %v2588_v9 = vpop.f32.mrb[11].mxu1  ;;  %v1494_v10 = vsel %vm1489_vm5, %v1483_v5, -1e+09  ;;  %v2821_v5 = vld [vmem:[%s3876_s16] sm:$0xff]  }
 0x394   : > { %v1475_v11 = vpop.f32.mrb[12].mxu0  ;;  %v1502_v12 = vsel %vm1296_vm3, %v1494_v10, -inf }
 0x395   : > { %v1484_v13 = vmul.f32 0.35355338, %v1475_v11  ;;  %1503 = vmax.xlane.f32.xlu0 %v1502_v12  ;;  %v2593_v14 = vpop.f32.mrb[13].mxu0 }
 0x396   : > { %v1478_v15 = vpop.f32.mrb[14].mxu0 }
 0x397   : > { %v2594_v16 = vpop.f32.mrb[15].mxu0  ;;  %v1495_v17 = vsel %vm1489_vm5, %v1484_v13, -1e+09 }
 0x398   : > { %v1505_v18 = vsel %vm1296_vm3, %v1495_v17, -inf }
 0x399   : > { %1506 = vmax.xlane.f32.xlu0 %v1505_v18 }
 0x3a2   : > { %1283 = vrot.lane.b32.xlu1 %v3942_v39, %s3264_s27  ;;  %s4271_s27 = sld [smem:[#allocation53_spill]] (!%p2493_p9) }
 0x3ab   : > { %v1498_v19 = vpop.xlane.xlu0 %1497 }
 0x3ac   : > { %v1508_v20 = vsub.f32 %v1492_v58, %v1498_v19 }
 0x3ae   : > { %v1512_v21 = vmul.f32 1.442695, %v1508_v20 }
 0x3b0   : > { %2829 = vpow2.f32 %v1512_v21 }
 0x3ba   : > { %v2830_v22 = vpop.eup %2829 }
 0x3bb   : > { %v1520_v23 = vsel %vm1296_vm3, %v2830_v22, 0.0 }
 0x3c6   : > { %1521 = vadd.xlane.f32.xlu1 %v1520_v23 }
 0x41e   : > { %v1501_v24 = vpop.xlane.xlu1 %1500 }
 0x41f   : > { %v1509_v25 = vsub.f32 %v1493_v1, %v1501_v24 }
 0x421   : > { %v1514_v26 = vmul.f32 1.442695, %v1509_v25 }
 0x422   : > { %v1504_v27 = vpop.xlane.xlu0 %1503  ;;  %v1284_v28 = vpop.permute.xlu1 %1283 }
 0x423   : > { %2831 = vpow2.f32 %v1514_v26  ;;  %v1510_v29 = vsub.f32 %v1494_v10, %v1504_v27  ;;  %v1293_v30 = vpack.c.bf16 %v1284_v28, %v1284_v28  ;;  %v2475_v27 = vld [vmem:[%s859_s25] ss:$0 sm:$0xff] }
 0x425   : > { %v1516_v31 = vmul.f32 1.442695, %v1510_v29  ;;  %v1595_v32 = vsel %vm1547_vm4, %v1293_v30, 0 }
 0x426   : > { %2602 = vmatpush3.bf16.msra.mxu0 %v1595_v32  ;;  %v1507_v33 = vpop.xlane.xlu0 %1506 }
 0x427   : > { %2833 = vpow2.f32 %v1516_v31  ;;  %v1511_v34 = vsub.f32 %v1495_v17, %v1507_v33  ;;  %2613 = vmatprep.subr.bf16.mxu0 %v3262_v4 }
 0x429   : > { %v1518_v35 = vmul.f32 1.442695, %v1511_v34 }
 0x42b   : > { %2835 = vpow2.f32 %v1518_v35 }
 0x42d   : > { %v2832_v36 = vpop.eup %2831 }
 0x42e   : > { %v1523_v37 = vsel %vm1296_vm3, %v2832_v36, 0.0 }
 0x42f   : > { %1524 = vadd.xlane.f32.xlu0 %v1523_v37 }
 0x431   : > { %v2834_v38 = vpop.eup %2833 }
 0x432   : > { %v1526_v40 = vsel %vm1296_vm3, %v2834_v38, 0.0 }
 0x433   : > { %1527 = vadd.xlane.f32.xlu1 %v1526_v40 }
 0x435   : > { %v2836_v41 = vpop.eup %2835 }
 0x436   : > { %v1529_v42 = vsel %vm1296_vm3, %v2836_v41, 0.0 }
 0x437   : > { %1530 = vadd.xlane.f32.xlu0 %v1529_v42  ;;  %v2824_v42 = vld [vmem:[%s3881_s23 + $0x8] sm:$0xff]  }
 0x444   : > { %1289 = vrot.lane.b32.xlu1 %v3942_v39, %s3265_s15 }
 0x44d   : > { %1286 = vrot.lane.b32.xlu0 %v3942_v39, %s3266_s14 }
 0x453   : > { %v1522_v43 = vpop.xlane.xlu1 %1521 }
 0x454   : > { %2837 = vrcp.f32 %v1522_v43  ;;  %v2826_v43 = vld [vmem:[%s3866_s18 + $0x8] sm:$0xff]  }
 0x45e   : > { %v2838_v44 = vpop.eup %2837 }
 0x45f   : > { %v1533_v45 = vmul.f32 %v2838_v44, %v2830_v22 }
 0x461   : > { %v1540_v46 = vpack.c.bf16 %v1533_v45, %v1533_v45 }
 0x463   : > { %2598 = vmatmul.mubr.msk.bf16.vlgmr.msra.gmra.mrb[12].mxu1 %vm1296_vm3, %v1540_v46 }
 0x464   : > { %2609 = vmatprep.mubr.msk.bf16.mxu1 %vm3263_vm1, %v3262_v4 }
 0x4bc   : > { %v1525_v47 = vpop.xlane.xlu0 %1524 }
 0x4bd   : > { %2839 = vrcp.f32 %v1525_v47 }
 0x4c0   : > { %v1528_v48 = vpop.xlane.xlu1 %1527 }
 0x4c1   : > { %2841 = vrcp.f32 %v1528_v48  ;;  %v2479_v48 = vld [vmem:[%s867_s29] ss:$0 sm:$0xff] }
 0x4c4   : > { %v1531_v49 = vpop.xlane.xlu0 %1530  ;;  %v1290_v50 = vpop.permute.xlu1 %1289 }
 0x4c5   : > { %2843 = vrcp.f32 %v1531_v49  ;;  %v1295_v39 = vpack.c.bf16 %v1290_v50, %v1290_v50  ;;  %v2480_v50 = vld [vmem:[%s875_s3] ss:$0 sm:$0xff] }
 0x4c7   : > { %v2840_v51 = vpop.eup %2839  ;;  %v1687_v59 = vsel %vm1547_vm4, %v1295_v39, 0 }
 0x4c8   : > { %v1535_v52 = vmul.f32 %v2840_v51, %v2832_v36  ;;  %v1287_v53 = vpop.permute.xlu0 %1286 }
 0x4c9   : > { %v1294_v54 = vpack.c.bf16 %v1287_v53, %v1287_v53  ;;  %v2827_v53 = vld [vmem:[%s3866_s18 + $0x10] sm:$0xff]  }
 0x4ca   : > { %v1541_v55 = vpack.c.bf16 %v1535_v52, %v1535_v52 }
 0x4cb   : > { %v2842_v56 = vpop.eup %2841  ;;  %v1641_v57 = vsel %vm1547_vm4, %v1294_v54, 0  ;;  %v2828_v54 = vld [vmem:[%s3866_s18 + $0x18] sm:$0xff]  }
 0x4cc   : > { %v1537_v58 = vmul.f32 %v2842_v56, %v2834_v38  ;;  %2604 = vmatmul.mubr.msk.bf16.vlgmr.msra.gmra.mrb[16].mxu0 %vm1296_vm3, %v1541_v55  ;;  %2608 = vmatpush3.bf16.msra.mxu1 %v1641_v57  ;;  %v2481_v55 = vld [vmem:[%s892_s10] ss:$0 sm:$0xff] }
 0x4cd   : > { %2614 = vmatpush3.bf16.msra.mxu0 %v1687_v59  ;;  %2615 = vmatprep.mubr.msk.bf16.mxu0 %vm3263_vm1, %v3262_v4 }
 0x4ce   : > { %v1542_v60 = vpack.c.bf16 %v1537_v58, %v1537_v58  ;;  %2619 = vmatprep.subr.bf16.mxu1 %v3262_v4  ;;  %2627 = vmatprep.subr.bf16.mxu0 %v3262_v4 }
 0x4cf   : > { %v2844_v61 = vpop.eup %2843 }
 0x4d0   : > { %v1539_v62 = vmul.f32 %v2844_v61, %v2836_v41  ;;  %2610 = vmatmul.mubr.msk.bf16.vlgmr.msra.gmra.mrb[16].mxu1 %vm1296_vm3, %v1542_v60  ;;  %v2823_v41 = vld [vmem:[%s3881_s23] sm:$0xff]  }
 0x4d1   : > { %2623 = vmatprep.mubr.msk.bf16.mxu1 %vm3263_vm1, %v3262_v4  ;;  %2620 = vmatpush3.bf16.msra.mxu1 %v2821_v5 }
 0x4d2   : > { %v1543_v63 = vpack.c.bf16 %v1539_v62, %v1539_v62  ;;  %2621 = vmatprep.subr.bf16.mxu1 %v3262_v4 }
 0x4d4   : > { %2616 = vmatmul.mubr.msk.bf16.vlgmr.msra.gmra.mrb[20].mxu0 %vm1296_vm3, %v1543_v63  ;;  %v2485_v63 = vld [vmem:[%s1042_s6] ss:$0 sm:$0xff] }
 0x4d5   : > { %2631 = vmatprep.mubr.msk.bf16.mxu0 %vm3263_vm1, %v3262_v4  ;;  %2622 = vmatpush3.bf16.msra.mxu1 %v2822_v6 }
 0x4d6   : > { %2635 = vmatprep.subr.bf16.mxu1 %v3262_v4  ;;  %2628 = vmatpush3.bf16.msra.mxu0 %v2823_v41 }
 0x4d7   : > { %2629 = vmatprep.subr.bf16.mxu0 %v3262_v4 }
 0x4da   : > { %2630 = vmatpush3.bf16.msra.mxu0 %v2824_v42 }
 0x536   : > { %v1585_v0 = vpop.f32.mrb[12].mxu1 }
 0x537   : > { %v2599_v1 = vpop.f32.mrb[13].mxu1 }
 0x538   : > { %v1588_v2 = vpop.f32.mrb[14].mxu1 }
 0x539   : > { %v2600_v3 = vpop.f32.mrb[15].mxu1 }
 0x59f   : > { %v1631_v7 = vpop.f32.mrb[16].mxu0 }
 0x5a0   : > { %1730 = vrot.lane.b32.xlu1 %v1631_v7, %s3267_s8  ;;  %v2605_v9 = vpop.f32.mrb[17].mxu0 }
 0x5a1   : > { %v1634_v10 = vpop.f32.mrb[18].mxu0 }
 0x5a2   : > { %v2606_v11 = vpop.f32.mrb[19].mxu0 }
 0x5a3   : > { %v1677_v12 = vpop.f32.mrb[16].mxu1 }
 0x5a4   : > { %1734 = vrot.lane.b32.xlu0 %v1677_v12, %s3268_s26  ;;  %v2611_v13 = vpop.f32.mrb[17].mxu1 }
 0x5a5   : > { %v1680_v14 = vpop.f32.mrb[18].mxu1 }
 0x5a6   : > { %v2612_v15 = vpop.f32.mrb[19].mxu1 }
 0x5a7   : > { %v1723_v16 = vpop.f32.mrb[20].mxu0 }
 0x5a8   : > { %1738 = vrot.lane.b32.xlu1 %v1723_v16, %s3269_s22  ;;  %v2617_v17 = vpop.f32.mrb[21].mxu0 }
 0x5a9   : > { %v1726_v18 = vpop.f32.mrb[22].mxu0  ;;  %v2491_v17 = vld [vmem:[%s1045_s11] ss:$0 sm:$0xff] }
 0x5aa   : > { %v2618_v19 = vpop.f32.mrb[23].mxu0 }
 0x5ab   : > { %v2492_v19 = vld [vmem:[%s1048_s4] ss:$0 sm:$0xff] }
 0x612   : > { %v1731_v20 = vpop.permute.xlu1 %1730 }
 0x613   : > { %v1741_v22 = vsel %vm1296_vm3, %v1585_v0, %v1731_v20 }
 0x616   : > { %v1735_v21 = vpop.permute.xlu0 %1734 }
 0x617   : > { %v1743_v23 = vsel %vm1742_vm6, %v1741_v22, %v1735_v21  ;;  %v2849_v22 = vld [vmem:[%s4270_s21] sm:$0xff] (!%p2493_p9)  }
 0x61a   : > { %v1739_v24 = vpop.permute.xlu1 %1738 }
 0x61b   : > { %v1745_v25 = vsel %vm1744_vm7, %v1743_v23, %v1739_v24  ;;  %v3270_v23 = vmov (!%p2493_p9), 0.0   ;;  %v2850_v24 = vld [vmem:[%s4270_s21 + $0x8] sm:$0xff] (!%p2493_p9)  }
 0x61c   : > { %v1746_v26 = vpack.c.bf16 %v1745_v25, %v1745_v25  ;;  %2647 = vmatprep.subr.bf16.mxu0 (!%p2493_p9), %v3270_v23 }
 0x61e   : > { %2624 = vmatmul.mubr.msk.bf16.vlgmr.msra.gmra.mrb[20].mxu1 %vm1084_vm2, %v1746_v26  ;;  %v2494_v26 = vld [vmem:[%s4271_s27] ss:$0 sm:$0xff] (!%p2493_p9) }
 0x61f   : > { %2643 = vmatprep.mubr.msk.bf16.mxu1 %vm3263_vm1, %v3262_v4 }
 0x6f1   : > { %v1807_v28 = vpop.f32.mrb[20].mxu1 }
 0x6f2   : > { %v1808_v29 = vadd.f32 %v2475_v27, %v1807_v28  ;;  %v2625_v30 = vpop.f32.mrb[21].mxu1 }
 0x6f3   : > { %v1810_v31 = vpop.f32.mrb[22].mxu1 }
 0x6f4   : > { %v2626_v32 = vpop.f32.mrb[23].mxu1  ;;  %v1813_v33 = vadd.f32 %v1808_v29, %v3898_v8  ;;  %v2825_v8 = vld [vmem:[%s3866_s18] sm:$0xff]  }
 0x6f5   : > { %2636 = vmatpush3.bf16.msra.mxu1 %v2825_v8 }
 0x6f6   : > { %v1816_v34 = vsel %vm1084_vm2, %v1813_v33, 0.0  ;;  %2637 = vmatprep.subr.bf16.mxu1 %v3262_v4 }
 0x6f7   : > { %1817 = vadd.xlane.f32.xlu0 %v1816_v34 }
 0x6f9   : > { %2638 = vmatpush3.bf16.msra.mxu1 %v2826_v43 }
 0x6fa   : > { %2639 = vmatprep.subr.bf16.mxu1 %v3262_v4 }
 0x6fd   : > { %2640 = vmatpush3.bf16.msra.mxu1 %v2827_v53 }
 0x6fe   : > { %2641 = vmatprep.subr.bf16.mxu1 %v3262_v4 }
 0x701   : > { %2642 = vmatpush3.bf16.msra.mxu1 %v2828_v54 }
 0x784   : > { %v1818_v35 = vpop.xlane.xlu0 %1817 }
 0x785   : > { %v1820_v36 = vmul.f32 0.03125, %v1818_v35 }
 0x787   : > { %v1821_v37 = vsub.f32 %v1813_v33, %v1820_v36 }
 0x789   : > { %v1822_v38 = vmul.f32 %v1821_v37, %v1821_v37 }
 0x78b   : > { %v1823_v40 = vsel %vm1084_vm2, %v1822_v38, 0.0 }
 0x78c   : > { %1824 = vadd.xlane.f32.xlu1 %v1823_v40 }
 0x819   : > { %v1825_v44 = vpop.xlane.xlu1 %1824 }
 0x81a   : > { %v1826_v45 = vmul.f32 0.03125, %v1825_v44 }
 0x81c   : > { %v1827_v46 = vadd.f32 1e-05, %v1826_v45 }
 0x81e   : > { %2845 = vrsqrt.f32 %v1827_v46 }
 0x828   : > { %v2846_v47 = vpop.eup %2845 }
 0x829   : > { %v1829_v49 = vmul.f32 %v2846_v47, %v1821_v37 }
 0x82b   : > { %v1836_v51 = vmul.f32 %v2479_v48, %v1829_v49 }
 0x82d   : > { %v1843_v52 = vadd.f32 %v2480_v50, %v1836_v51 }
 0x82f   : > { %v1844_v39 = vpack.c.bf16 %v1843_v52, %v1843_v52 }
 0x831   : > { %2632 = vmatmul.mubr.msk.bf16.vlgmr.msra.gmra.mrb[24].mxu0 %vm1084_vm2, %v1844_v39 }
 0x832   : > { %2648 = vmatpush3.bf16.msra.mxu0 (!%p2493_p9), %v2849_v22  ;;  %2651 = vmatprep.mubr.msk.bf16.mxu0 (!%p2493_p9), %vm3271_vm9, %v3270_v23 }
 0x833   : > { %2649 = vmatprep.subr.bf16.mxu0 (!%p2493_p9), %v3270_v23 }
 0x836   : > { %2650 = vmatpush3.bf16.msra.mxu0 (!%p2493_p9), %v2850_v24 }
 0x904   : > { %v1905_v56 = vpop.f32.mrb[24].mxu0 }
 0x905   : > { %v1906_v57 = vadd.f32 %v2481_v55, %v1905_v56  ;;  %v2633_v58 = vpop.f32.mrb[25].mxu0 }
 0x906   : > { %v1908_v59 = vpop.f32.mrb[26].mxu0 }
 0x907   : > { %v1911_v60 = vmax.f32 %v1906_v57, 0.0  ;;  %v2634_v61 = vpop.f32.mrb[27].mxu0 }
 0x909   : > { %v1912_v62 = vpack.c.bf16 %v1911_v60, %v1911_v60 }
 0x90b   : > { %2644 = vmatmul.mubr.msk.bf16.vlgmr.msra.gmra.mrb[24].mxu1 %vm1952_vm8, %v1912_v62 }
 0x9de   : > { %v1990_v0 = vpop.f32.mrb[24].mxu1 }
 0x9df   : > { %v1991_v4 = vadd.f32 %v2485_v63, %v1990_v0  ;;  %v2645_v1 = vpop.f32.mrb[25].mxu1 }
 0x9e0   : > { %v1993_v2 = vpop.f32.mrb[26].mxu1 }
 0x9e1   : > { %v2646_v3 = vpop.f32.mrb[27].mxu1  ;;  %v1996_v5 = vadd.f32 %v1991_v4, %v1843_v52 }
 0x9e3   : > { %v1999_v6 = vsel %vm1084_vm2, %v1996_v5, 0.0 }
 0x9e4   : > { %2000 = vadd.xlane.f32.xlu0 %v1999_v6 }
 0xa71   : > { %v2001_v7 = vpop.xlane.xlu0 %2000 }
 0xa72   : > { %v2002_v9 = vmul.f32 0.03125, %v2001_v7 }
 0xa74   : > { %v2003_v10 = vsub.f32 %v1996_v5, %v2002_v9 }
 0xa76   : > { %v2004_v11 = vmul.f32 %v2003_v10, %v2003_v10 }
 0xa78   : > { %v2005_v12 = vsel %vm1084_vm2, %v2004_v11, 0.0 }
 0xa79   : > { %2006 = vadd.xlane.f32.xlu0 %v2005_v12 }
 0xb06   : > { %v2007_v13 = vpop.xlane.xlu0 %2006 }
 0xb07   : > { %v2008_v14 = vmul.f32 0.03125, %v2007_v13 }
 0xb09   : > { %v2009_v15 = vadd.f32 1e-05, %v2008_v14 }
 0xb0b   : > { %2847 = vrsqrt.f32 %v2009_v15 }
 0xb15   : > { %v2848_v16 = vpop.eup %2847 }
 0xb16   : > { %v2011_v18 = vmul.f32 %v2848_v16, %v2003_v10  ;;  %2030 = sbr.rel (%p2493_p9) target bundleno = 3061 (0xbf5), region = 144 }
 0xb18   : > { %v2018_v20 = vmul.f32 %v2491_v17, %v2011_v18 }
 0xb1a   : > { %v2025_v21 = vadd.f32 %v2492_v19, %v2018_v20 }
 0xb1c   : > { %2026 = vst.msk [vmem:[#allocation2] sm:$0xff] %vm1084_vm2, %v2025_v21  ;;  %v2031_v25 = vpack.c.bf16 (!%p2493_p9), %v2025_v21, %v2025_v21 }
 0xb1e   : > { %2652 = vmatmul.mubr.msk.bf16.vlgmr.msra.gmra.mrb[0].mxu0 %vm1084_vm2, %v2031_v25 }
 0xbf1   : > { %v2092_v27 = vpop.f32.mrb[0].mxu0 }
 0xbf2   : > { %v2093_v28 = vadd.f32 %v2494_v26, %v2092_v27  ;;  %v2653_v29 = vpop.f32.mrb[1].mxu0 }
 0xbf3   : > { %v2095_v30 = vpop.f32.mrb[2].mxu0 }
 0xbf4   : > { %2098 = vst [vmem:[%s1013_s17] sm:$0xff] %v2093_v28  ;;  %v2654_v31 = vpop.f32.mrb[3].mxu0 }
 0xbf5 PF: > { %s4272_s15 = sld [smem:[#allocation25_spill]]  ;;  %s4273_s20 = sld [smem:[#allocation54_spill]] }
 0xbf6   : > { %s2113_s8 = sshll.u32 %s1013_s17, 4  ;;  %s4274_s26 = sand.u32 1, %s3225_s2   ;;  %s2114_s8 = int_to_ptr.vmem [resolvable:$true] %s2113_s8 }
 0xbf7   : > { %s2100_s22 = scalar_lea.sflag [#allocation5], %s4274_s26  ;;  %s3119_s3 = scalar_lea.vmem %s2114_s8, 128 }
 0xbf8   : > { %p3120_p2 = scmp.ne.s32.totalorder %s2114_s8, %s3119_s3  ;;  %p4275_p12 = scmp.ne.s32.totalorder %s4236_s0, 0 }
 0xbf9   : > { %s3272_s16 = smov [#allocation15]  }
 0xbfa   : > { %p3121_p3 = pnand %p3120_p2, %p4275_p12  ;;  %s3123_s25 = sshll.u32 %s3272_s16, 4  ;;  %s3124_s25 = int_to_ptr.vmem [resolvable:$false] %s3123_s25 }
 0xbfb   : > { %s2499_s14 = sshll.u32 %s4272_s15, 7  ;;  %s3125_s5 = scalar_lea.vmem %s3124_s25, 256 }
 0xbfc   : > { %s4062_s30 = scalar_lea.hbm %s4273_s20, %s2499_s14  ;;  %p3122_p5 = pneg %p3121_p3 }
 0xbfd   : > { %p3126_p8 = scmp.lt.s32.totalorder %s2114_s8, %s3124_s25  ;;  %p3127_p0 = scmp.lt.s32.totalorder %s3125_s5, %s3119_s3 }
 0xbff   : > { %p3128_p13 = por %p3127_p0, %p3126_p8 }
 0xc01   : > { %p3129_p11 = pnand %p3128_p13, %p3122_p5 }
 0xc03   : > { %3132 = shalt.err (!%p3129_p11)
}
 0xc04   : > { %s3133_s7 = scalar_lea.hbm %s4062_s30, 128  ;;  %s3137_s18 = scalar_lea.hbm %s4273_s20, 256 }
 0xc05   : > { %p3134_p4 = scmp.ne.s32.totalorder %s4062_s30, %s3133_s7  ;;  %p3138_p10 = scmp.lt.u32.totalorder %s4062_s30, %s4273_s20 }
 0xc06   : > { %p3139_p7 = scmp.lt.u32.totalorder %s3137_s18, %s3133_s7  ;;  %p3141_p2 = scmp.lt.u32.totalorder %s3133_s7, %s4062_s30 }
 0xc07   : > { %p3135_p6 = pnand %p3134_p4, %p4275_p12 }
 0xc08   : > { %p3140_p9 = por %p3139_p7, %p3138_p10 }
 0xc09   : > { %p3136_p1 = pneg %p3135_p6 }
 0xc0a   : > { %p3142_p3 = por %p3141_p2, %p3140_p9 }
 0xc0c   : > { %p3143_p5 = pnand %p3142_p3, %p3136_p1 }
 0xc0e   : > { %3146 = shalt.err (!%p3143_p5)
}
 0xc0f   : > { %2675 = dma.vmem_to_hbm [thread:$0]  (%p4275_p12), %s2114_s8, 128, %s4062_s30, %s2100_s22  }
 0xc10 PF: > { %s4276_s10 = sld [smem:[#allocation28_spill]]  ;;  %s4277_s24 = sld [smem:[#allocation22_spill]] }
 0xc11   : > { %s4278_s1 = sld [smem:[#allocation33_spill]] }
 0xc16   : > { %p2713_p8 = scmp.ge.s32.totalorder %s4276_s10, 2  ;;  %s2125_s9 = sand.u32 1, %s4277_s24  }
 0xc17   : > { %p4279_p0 = scmp.ne.s32.totalorder %s4278_s1, 0  ;;  %s2126_s11 = scalar_lea.sflag [#allocation5], %s2125_s9 }
 0xc19   : > { %p2707_p13 = pnand %p2713_p8, %p4279_p0 }
 0xc1b   : > { %3204 = dma.done.wait (!%p2707_p13), %s2126_s11, 128  }
 0xc1c   : > { %3206 = vsyncadd (!%p2707_p13), %s2126_s11, 4294967168  ;;  %s37_s4 = sadd.s32 1, %s4276_s10   ;;  %s4280_s1 = sld [smem:[#allocation20_spill]] }
 0xc1d   : > { %p34_p11 = scmp.ge.s32.totalorder %s37_s4, 6   ;;  %s4281_s22 = sld [smem:[#allocation21_spill]] }
 0xc1e   : > { %s4282_s23 = sld [smem:[#allocation31_spill]]  ;;  %s4283_s0 = sld [smem:[#allocation23_spill]] }
 0xc1f   : > { %s4284_s25 = sld [smem:[#allocation32_spill]]  ;;  %s4285_s3 = sld [smem:[#allocation26_spill]] }
 0xc20   : > { %s4286_s26 = sld [smem:[#allocation27_spill]]  ;;  %s4287_s27 = sld [smem:[#allocation29_spill]] }
 0xc21   : > { %s4288_s28 = sld [smem:[#allocation30_spill]]  ;;  %s4289_s24 = smov %s3225_s2 }
 0xc22   :  { %36 = sbr.rel (!%p34_p11) target bundleno = 32 (0x20), region = 261 }
 0xc24   : > { %s4290_s2 = smov %s4283_s0 }
 0xc29   :  { %2131 = vsyncpa [#allocation4], 1 }
 0xc2a   :  { %2133 = vsyncpa [#allocation4 + $0x1], 1 }
 0xc2b   :  { %2134 = vsyncpa [#allocation7], 1 }
 0xc2c   :  { %2135 = vsyncpa [#allocation5], 1 }
 0xc2d   :  { %2137 = vsyncpa [#allocation5 + $0x1], 1 }

</bundles_post_ra>
